<compile_context>
chip_gen: v6e
topology: v6e:2x2x1
jax: 0.10.0
libtpu: 0.0.40
codegen_flags: <defaults>
</compile_context>

<pallas_src>
import jax
import jax.numpy as jnp
from jax.experimental import pallas as pl
from jax.experimental.pallas import tpu as pltpu

INPUT_DIM = 32
H1 = 256
H2 = 512
IMG = 32
OUT = IMG * IMG  # 1024


# ---------------------------------------------------------------------------
# Fused Pallas kernel: the entire Generator forward for one batch tile
# ---------------------------------------------------------------------------
def _generator_kernel(x_ref, w1_ref, b1_ref, w2_ref, b2_ref, w3_ref, b3_ref,
                      o_ref):
    # Layer 1: (TB, 32) @ (32, 256) + b1, ReLU      (MXU + VPU)
    h1 = jnp.dot(x_ref[...], w1_ref[...], preferred_element_type=jnp.float32)
    h1 = jnp.maximum(h1 + b1_ref[...], 0.0)
    # Layer 2: (TB, 256) @ (256, 512) + b2, ReLU    (MXU + VPU)
    h2 = jnp.dot(h1, w2_ref[...], preferred_element_type=jnp.float32)
    h2 = jnp.maximum(h2 + b2_ref[...], 0.0)
    # Layer 3: (TB, 512) @ (512, 1024) + b3, Tanh   (MXU + EUP)
    h3 = jnp.dot(h2, w3_ref[...], preferred_element_type=jnp.float32)
    o_ref[...] = jnp.tanh(h3 + b3_ref[...]).astype(o_ref.dtype)


# ---------------------------------------------------------------------------
# Wrapper: batch-tiled single pallas_call, then the (free) final reshape
# ---------------------------------------------------------------------------
def generator_forward(x, params):
    w1, b1, w2, b2, w3, b3 = params
    B = x.shape[0]

    # Pad batch rows up to a sublane multiple; pick a row-tile size so the
    # grid axis can be split across TensorCores for larger batches.
    pb = ((B + 7) // 8) * 8
    TB = 128 if pb >= 128 else pb
    pb = ((pb + TB - 1) // TB) * TB
    xp = jnp.pad(x, ((0, pb - B), (0, 0))) if pb != B else x

    out = pl.pallas_call(
        _generator_kernel,
        out_shape=jax.ShapeDtypeStruct((pb, OUT), jnp.float32),
        grid=(pb // TB,),
        in_specs=[
            pl.BlockSpec((TB, INPUT_DIM), lambda i: (i, 0)),   # x tile
            pl.BlockSpec((INPUT_DIM, H1), lambda i: (0, 0)),   # w1 (resident)
            pl.BlockSpec((1, H1), lambda i: (0, 0)),           # b1
            pl.BlockSpec((H1, H2), lambda i: (0, 0)),          # w2
            pl.BlockSpec((1, H2), lambda i: (0, 0)),           # b2
            pl.BlockSpec((H2, OUT), lambda i: (0, 0)),         # w3
            pl.BlockSpec((1, OUT), lambda i: (0, 0)),          # b3
        ],
        out_specs=pl.BlockSpec((TB, OUT), lambda i: (i, 0)),
        compiler_params=pltpu.CompilerParams(
            dimension_semantics=("parallel",)),
    )(xp, w1, b1, w2, b2, w3, b3)

    # Matches torch's x.view(-1, 1, img_size, img_size).
    return out[:B].reshape(B, 1, IMG, IMG)


# ---------------------------------------------------------------------------
# Deterministic parameter init (weights stored (in, out); real PyTorch
# nn.Linear weights of shape (out, in) must be transposed before use here).
# ---------------------------------------------------------------------------
def init_params(key):
    k1, k2, k3, k4, k5, k6 = jax.random.split(key, 6)
    w1 = jax.random.normal(k1, (INPUT_DIM, H1), jnp.float32) / jnp.sqrt(INPUT_DIM)
    b1 = jax.random.normal(k2, (1, H1), jnp.float32) * 0.01
    w2 = jax.random.normal(k3, (H1, H2), jnp.float32) / jnp.sqrt(H1)
    b2 = jax.random.normal(k4, (1, H2), jnp.float32) * 0.01
    w3 = jax.random.normal(k5, (H2, OUT), jnp.float32) / jnp.sqrt(H2)
    b3 = jax.random.normal(k6, (1, OUT), jnp.float32) * 0.01
    return (w1, b1, w2, b2, w3, b3)


def _reference_forward(x, params):
    w1, b1, w2, b2, w3, b3 = params
    h1 = jnp.maximum(
        jnp.dot(x, w1, preferred_element_type=jnp.float32) + b1, 0.0)
    h2 = jnp.maximum(
        jnp.dot(h1, w2, preferred_element_type=jnp.float32) + b2, 0.0)
    y = jnp.tanh(jnp.dot(h2, w3, preferred_element_type=jnp.float32) + b3)
    return y.reshape(x.shape[0], 1, IMG, IMG)


if __name__ == "__main__":
    key = jax.random.PRNGKey(0)
    kx, kp = jax.random.split(key)
    B = 2
    x = jax.random.normal(kx, (B, INPUT_DIM), jnp.float32)
    params = init_params(kp)

    fwd = jax.jit(generator_forward)
    out = jax.block_until_ready(fwd(x, params))

    assert out.shape == (B, 1, IMG, IMG) and out.dtype == jnp.float32
    ref = _reference_forward(x, params)
    assert bool(jnp.all(jnp.isfinite(out)))
    assert bool(jnp.allclose(out, ref, atol=1e-3, rtol=1e-3))
    print("KERNEL_OK")
</pallas_src>

<mosaic_0001>
module attributes {stable_mosaic.version = 11 : i64} {
  func.func @_generator_kernel(%arg0: i32, %arg1: memref<8x32xf32, #tpu.memory_space<vmem>>, %arg2: memref<32x256xf32, #tpu.memory_space<vmem>>, %arg3: memref<1x256xf32, #tpu.memory_space<vmem>>, %arg4: memref<256x512xf32, #tpu.memory_space<vmem>>, %arg5: memref<1x512xf32, #tpu.memory_space<vmem>>, %arg6: memref<512x1024xf32, #tpu.memory_space<vmem>>, %arg7: memref<1x1024xf32, #tpu.memory_space<vmem>>, %arg8: memref<8x1024xf32, #tpu.memory_space<vmem>>) attributes {dimension_semantics = [#tpu.dimension_semantics<parallel>], iteration_bounds = array<i64: 1>, scalar_prefetch = 0 : i64, scratch_operands = 0 : i64, tpu.core_type = #tpu.core_type<tc>, window_params = [{transform_indices = @transform_0, window_bounds = array<i64: 8, 32>}, {pipeline_mode = #tpu.pipeline_mode<synchronous>, transform_indices = @transform_1, window_bounds = array<i64: 32, 256>}, {pipeline_mode = #tpu.pipeline_mode<synchronous>, transform_indices = @transform_2, window_bounds = array<i64: 1, 256>}, {pipeline_mode = #tpu.pipeline_mode<synchronous>, transform_indices = @transform_3, window_bounds = array<i64: 256, 512>}, {pipeline_mode = #tpu.pipeline_mode<synchronous>, transform_indices = @transform_4, window_bounds = array<i64: 1, 512>}, {pipeline_mode = #tpu.pipeline_mode<synchronous>, transform_indices = @transform_5, window_bounds = array<i64: 512, 1024>}, {pipeline_mode = #tpu.pipeline_mode<synchronous>, transform_indices = @transform_6, window_bounds = array<i64: 1, 1024>}, {transform_indices = @transform_7, window_bounds = array<i64: 8, 1024>}]} {
    %c0 = arith.constant 0 : index
    %c0_0 = arith.constant 0 : index
    %0 = vector.load %arg1[%c0, %c0_0] : memref<8x32xf32, #tpu.memory_space<vmem>>, vector<8x32xf32>
    %c0_1 = arith.constant 0 : index
    %c0_2 = arith.constant 0 : index
    %1 = vector.load %arg2[%c0_1, %c0_2] : memref<32x256xf32, #tpu.memory_space<vmem>>, vector<32x256xf32>
    %cst = arith.constant dense<0.000000e+00> : vector<8x256xf32>
    %2 = tpu.matmul %0, %1, %cst {dimension_numbers = #tpu.dot_dimension_numbers<[1], [0], [0], [1], [0, 0, 1, 1], [], []>} : vector<8x32xf32>, vector<32x256xf32>, vector<8x256xf32> -> vector<8x256xf32>
    %c0_3 = arith.constant 0 : index
    %c0_4 = arith.constant 0 : index
    %3 = vector.load %arg3[%c0_3, %c0_4] : memref<1x256xf32, #tpu.memory_space<vmem>>, vector<1x256xf32>
    %4 = vector.broadcast %3 : vector<1x256xf32> to vector<8x256xf32>
    %5 = arith.addf %2, %4 : vector<8x256xf32>
    %cst_5 = arith.constant 0.000000e+00 : f32
    %6 = vector.broadcast %cst_5 : f32 to vector<8x256xf32>
    %7 = arith.maximumf %5, %6 : vector<8x256xf32>
    %c0_6 = arith.constant 0 : index
    %c0_7 = arith.constant 0 : index
    %8 = vector.load %arg4[%c0_6, %c0_7] : memref<256x512xf32, #tpu.memory_space<vmem>>, vector<256x512xf32>
    %cst_8 = arith.constant dense<0.000000e+00> : vector<8x512xf32>
    %9 = tpu.matmul %7, %8, %cst_8 {dimension_numbers = #tpu.dot_dimension_numbers<[1], [0], [0], [1], [0, 0, 1, 1], [], []>} : vector<8x256xf32>, vector<256x512xf32>, vector<8x512xf32> -> vector<8x512xf32>
    %c0_9 = arith.constant 0 : index
    %c0_10 = arith.constant 0 : index
    %10 = vector.load %arg5[%c0_9, %c0_10] : memref<1x512xf32, #tpu.memory_space<vmem>>, vector<1x512xf32>
    %11 = vector.broadcast %10 : vector<1x512xf32> to vector<8x512xf32>
    %12 = arith.addf %9, %11 : vector<8x512xf32>
    %cst_11 = arith.constant 0.000000e+00 : f32
    %13 = vector.broadcast %cst_11 : f32 to vector<8x512xf32>
    %14 = arith.maximumf %12, %13 : vector<8x512xf32>
    %c0_12 = arith.constant 0 : index
    %c0_13 = arith.constant 0 : index
    %15 = vector.load %arg6[%c0_12, %c0_13] : memref<512x1024xf32, #tpu.memory_space<vmem>>, vector<512x1024xf32>
    %cst_14 = arith.constant dense<0.000000e+00> : vector<8x1024xf32>
    %16 = tpu.matmul %14, %15, %cst_14 {dimension_numbers = #tpu.dot_dimension_numbers<[1], [0], [0], [1], [0, 0, 1, 1], [], []>} : vector<8x512xf32>, vector<512x1024xf32>, vector<8x1024xf32> -> vector<8x1024xf32>
    %c0_15 = arith.constant 0 : index
    %c0_16 = arith.constant 0 : index
    %17 = vector.load %arg7[%c0_15, %c0_16] : memref<1x1024xf32, #tpu.memory_space<vmem>>, vector<1x1024xf32>
    %18 = vector.broadcast %17 : vector<1x1024xf32> to vector<8x1024xf32>
    %19 = arith.addf %16, %18 : vector<8x1024xf32>
    %20 = math.tanh %19 : vector<8x1024xf32>
    %c0_17 = arith.constant 0 : index
    %c0_18 = arith.constant 0 : index
    %21 = vector.load %arg8[%c0_17, %c0_18] : memref<8x1024xf32, #tpu.memory_space<vmem>>, vector<8x1024xf32>
    tpu.vector_store %arg8[%c0_17, %c0_18], %20 {strides = array<i32>} : memref<8x1024xf32, #tpu.memory_space<vmem>>, vector<8x1024xf32>,
    return
  }
  func.func @transform_0(%arg0: i32) -> (i32, i32) {
    %c0_i32 = arith.constant 0 : i32
    %c0_i32_0 = arith.constant 0 : i32
    return %arg0, %c0_i32 : i32, i32
  }
  func.func @transform_1(%arg0: i32) -> (i32, i32) {
    %c0_i32 = arith.constant 0 : i32
    %c0_i32_0 = arith.constant 0 : i32
    %c0_i32_1 = arith.constant 0 : i32
    return %c0_i32, %c0_i32_0 : i32, i32
  }
  func.func @transform_2(%arg0: i32) -> (i32, i32) {
    %c0_i32 = arith.constant 0 : i32
    %c0_i32_0 = arith.constant 0 : i32
    %c0_i32_1 = arith.constant 0 : i32
    return %c0_i32, %c0_i32_0 : i32, i32
  }
  func.func @transform_3(%arg0: i32) -> (i32, i32) {
    %c0_i32 = arith.constant 0 : i32
    %c0_i32_0 = arith.constant 0 : i32
    %c0_i32_1 = arith.constant 0 : i32
    return %c0_i32, %c0_i32_0 : i32, i32
  }
  func.func @transform_4(%arg0: i32) -> (i32, i32) {
    %c0_i32 = arith.constant 0 : i32
    %c0_i32_0 = arith.constant 0 : i32
    %c0_i32_1 = arith.constant 0 : i32
    return %c0_i32, %c0_i32_0 : i32, i32
  }
  func.func @transform_5(%arg0: i32) -> (i32, i32) {
    %c0_i32 = arith.constant 0 : i32
    %c0_i32_0 = arith.constant 0 : i32
    %c0_i32_1 = arith.constant 0 : i32
    return %c0_i32, %c0_i32_0 : i32, i32
  }
  func.func @transform_6(%arg0: i32) -> (i32, i32) {
    %c0_i32 = arith.constant 0 : i32
    %c0_i32_0 = arith.constant 0 : i32
    %c0_i32_1 = arith.constant 0 : i32
    return %c0_i32, %c0_i32_0 : i32, i32
  }
  func.func @transform_7(%arg0: i32) -> (i32, i32) {
    %c0_i32 = arith.constant 0 : i32
    %c0_i32_0 = arith.constant 0 : i32
    return %arg0, %c0_i32 : i32, i32
  }
}

</mosaic_0001>

<bundles_post_ra>
// kernel: generator_forward.1
= control target key start
LH: loop header
LB: loop body
LE: loop exit
PB: predicated region body
PF: predicated region fallthrough
CT: control target
= control target key end

     0   :  { %12 = vsyncpa [#allocation3], 0  ;;  %s1960_s0 = inlined_call_operand.vmem [shape: f32[8,32], index: 0, kind: input, shape index: {}]   ;;  %s1961_s1 = inlined_call_operand.hbm [shape: f32[32,256], index: 1, kind: input, shape index: {}]   ;;  %s1962_s2 = inlined_call_operand.hbm [shape: f32[1,256], index: 2, kind: input, shape index: {}]   ;;  %s1963_s3 = inlined_call_operand.hbm [shape: f32[256,512], index: 3, kind: input, shape index: {}]   ;;  %s1964_s4 = inlined_call_operand.hbm [shape: f32[1,512], index: 4, kind: input, shape index: {}]   ;;  %s1965_s5 = inlined_call_operand.hbm [shape: f32[512,1024], index: 5, kind: input, shape index: {}]   ;;  %s1966_s6 = inlined_call_operand.hbm [shape: f32[1,1024], index: 6, kind: input, shape index: {}]   ;;  %s1967_s7 = inlined_call_operand.vmem [shape: f32[8,1024], index: 7, kind: output, shape index: {}]  }
   0x1   :  { %13 = vsyncpa [#allocation5], 0 }
   0x2   :  { %14 = vsyncpa [#allocation8], 0 }
   0x3   :  { %15 = vsyncpa [#allocation11], 0  ;;  %s1800_s24 = smov [#allocation4]   ;;  %s1801_s26 = smov [#allocation7]  }
   0x4   :  { %s36_s25 = sshll.u32 %s1800_s24, 4  ;;  %s58_s27 = sshll.u32 %s1801_s26, 4  ;;  %s37_s25 = int_to_ptr.vmem [resolvable:$true] %s36_s25  ;;  %s59_s27 = int_to_ptr.vmem [resolvable:$true] %s58_s27 }
   0x5   :  { %s1680_s28 = scalar_lea.vmem %s37_s25, 32  ;;  %p1685_p1 = scmp.lt.s32.totalorder %s37_s25, %s37_s25 }
   0x6   :  { %p1681_p0 = scmp.ne.s32.totalorder %s37_s25, %s1680_s28  ;;  %p1686_p2 = scmp.lt.s32.totalorder %s1680_s28, %s1680_s28 }
   0x8   :  { %p1687_p3 = por %p1686_p2, %p1685_p1 }
   0xa   :  { %p1688_p4 = pnand %p1687_p3, %p1681_p0 }
   0xc   :  { %1691 = shalt.err (!%p1688_p4)
}
   0xd   :  { %39 = dma.hbm_to_vmem [thread:$0]  %s1962_s2, 32, %s37_s25, [#allocation5]  }
   0xe   :  { %s1700_s8 = scalar_lea.vmem %s59_s27, 64  ;;  %p1705_p6 = scmp.lt.s32.totalorder %s59_s27, %s59_s27 }
   0xf   :  { %p1701_p5 = scmp.ne.s32.totalorder %s59_s27, %s1700_s8  ;;  %p1706_p7 = scmp.lt.s32.totalorder %s1700_s8, %s1700_s8 }
  0x11   :  { %p1707_p8 = por %p1706_p7, %p1705_p6 }
  0x13   :  { %p1708_p9 = pnand %p1707_p8, %p1701_p5 }
  0x15   :  { %1711 = shalt.err (!%p1708_p9)
}
  0x16   :  { %61 = dma.hbm_to_vmem [thread:$0]  %s1964_s4, 64, %s59_s27, [#allocation8]  }
  0x17   :  { %s1802_s11 = smov [#allocation2]  }
  0x18   :  { %s23_s12 = sshll.u32 %s1802_s11, 4  ;;  %s24_s12 = int_to_ptr.vmem [resolvable:$true] %s23_s12 }
  0x19   :  { %s1720_s13 = scalar_lea.vmem %s24_s12, 1024  ;;  %p1725_p11 = scmp.lt.s32.totalorder %s24_s12, %s24_s12 }
  0x1a   :  { %p1721_p10 = scmp.ne.s32.totalorder %s24_s12, %s1720_s13  ;;  %p1726_p12 = scmp.lt.s32.totalorder %s1720_s13, %s1720_s13 }
  0x1c   :  { %p1727_p13 = por %p1726_p12, %p1725_p11 }
  0x1e   :  { %p1728_p0 = pnand %p1727_p13, %p1721_p10 }
  0x20   :  { %1731 = shalt.err (!%p1728_p0)
}
  0x21   :  { %s1803_s2 = smov 256   ;;  %s1804_s14 = smov 16  }
  0x22   :  { %29 = dma.hbm_to_vmem [thread:$0]  %s1961_s1, 1024, %s24_s12, [#allocation3], %s1803_s2, %s1803_s2, %s1804_s14  }
  0x23   :  { %s1805_s17 = smov [#allocation6]  }
  0x24   :  { %s45_s18 = sshll.u32 %s1805_s17, 4  ;;  %s46_s18 = int_to_ptr.vmem [resolvable:$true] %s45_s18 }
  0x25   :  { %s1740_s4 = scalar_lea.vmem %s46_s18, 16384  ;;  %p1745_p2 = scmp.lt.s32.totalorder %s46_s18, %s46_s18 }
  0x26   :  { %p1741_p1 = scmp.ne.s32.totalorder %s46_s18, %s1740_s4  ;;  %p1746_p3 = scmp.lt.s32.totalorder %s1740_s4, %s1740_s4 }
  0x28   :  { %p1747_p4 = por %p1746_p3, %p1745_p2 }
  0x2a   :  { %p1748_p5 = pnand %p1747_p4, %p1741_p1 }
  0x2c   :  { %1751 = shalt.err (!%p1748_p5)
}
  0x2d   :  { %s1806_s19 = smov 512   ;;  %s1807_s20 = smov 32  }
  0x2e   :  { %51 = dma.hbm_to_vmem [thread:$0]  %s1963_s3, 16384, %s46_s18, [#allocation5], %s1806_s19, %s1806_s19, %s1807_s20  }
  0x2f   :  { %s1808_s23 = smov [#allocation9]  }
  0x30   :  { %s67_s24 = sshll.u32 %s1808_s23, 4  ;;  %s68_s24 = int_to_ptr.vmem [resolvable:$true] %s67_s24 }
  0x31   :  { %s1760_s1 = scalar_lea.vmem %s68_s24, 65536  ;;  %p1765_p7 = scmp.lt.s32.totalorder %s68_s24, %s68_s24 }
  0x32   :  { %p1761_p6 = scmp.ne.s32.totalorder %s68_s24, %s1760_s1  ;;  %p1766_p8 = scmp.lt.s32.totalorder %s1760_s1, %s1760_s1 }
  0x34   :  { %p1767_p9 = por %p1766_p8, %p1765_p7 }
  0x36   :  { %p1768_p10 = pnand %p1767_p9, %p1761_p6 }
  0x38   :  { %1771 = shalt.err (!%p1768_p10)
}
  0x39   :  { %s1809_s25 = smov 1024   ;;  %s1810_s26 = smov 64  }
  0x3a   :  { %73 = dma.hbm_to_vmem [thread:$0]  %s1965_s5, 65536, %s68_s24, [#allocation8], %s1809_s25, %s1809_s25, %s1810_s26  }
  0x3b   :  { %s1811_s29 = smov [#allocation10]  }
  0x3c   :  { %s80_s30 = sshll.u32 %s1811_s29, 4  ;;  %s81_s30 = int_to_ptr.vmem [resolvable:$true] %s80_s30 }
  0x3d   :  { %s1780_s3 = scalar_lea.vmem %s81_s30, 128  ;;  %p1785_p12 = scmp.lt.s32.totalorder %s81_s30, %s81_s30 }
  0x3e   :  { %p1781_p11 = scmp.ne.s32.totalorder %s81_s30, %s1780_s3  ;;  %p1786_p13 = scmp.lt.s32.totalorder %s1780_s3, %s1780_s3 }
  0x40   :  { %p1787_p0 = por %p1786_p13, %p1785_p12 }
  0x42   :  { %p1788_p1 = pnand %p1787_p0, %p1781_p11 }
  0x44   :  { %1791 = shalt.err (!%p1788_p1)
}
  0x45   :  { %83 = dma.hbm_to_vmem [thread:$0]  %s1966_s6, 128, %s81_s30, [#allocation11]  }
  0x46   :  { %1792 = dma.done.wait [#allocation3], 1024  }
  0x47   :  { %1793 = vsyncadd [#allocation3], 4294966272 }
  0x48   :  { %1794 = dma.done.wait [#allocation5], 16416  }
  0x49   :  { %1795 = vsyncadd [#allocation5], 4294950880 }
  0x4a   :  { %1796 = dma.done.wait [#allocation8], 65600  }
  0x4b   :  { %1797 = vsyncadd [#allocation8], 4294901696 }
  0x4c   :  { %1798 = dma.done.wait [#allocation11], 128  }
  0x4d   :  { %1799 = vsyncadd [#allocation11], 4294967168  ;;  %v1812_v0 = vmov 0.0   ;;  %v110_v1 = vld [vmem:[#allocation2 + $0x38] sm:$0xff]  ;;  %v109_v2 = vld [vmem:[#allocation2 + $0x30] sm:$0xff]  ;;  %vm123_vm0 = vcmask 261120  }
  0x4e   :  { %191 = vmatprep.mubr.f32.mxu0 %v1812_v0  ;;  %v108_v3 = vld [vmem:[#allocation2 + $0x28] sm:$0xff]  ;;  %151 = vmatprep.subr.mxu0 %v110_v1  ;;  %v107_v4 = vld [vmem:[#allocation2 + $0x20] sm:$0xff]  ;;  %v106_v5 = vld [vmem:[#allocation2 + $0x18] sm:$0xff] }
  0x4f   :  { %152 = vmatpush1.msra.mxu0 %v109_v2  ;;  %v105_v6 = vld [vmem:[#allocation2 + $0x10] sm:$0xff]  ;;  %v260_v8 = vld [vmem:[#allocation6 + $0x1e0] sm:$0xff]  ;;  %v263_v15 = vld [vmem:[#allocation6 + $0x1f8] sm:$0xff] }
  0x50   :  { %153 = vmatprep.subr.mxu0 %v108_v3  ;;  %v261_v7 = vld [vmem:[#allocation6 + $0x1e8] sm:$0xff]  ;;  %v103_v11 = vld [vmem:[#allocation2] sm:$0xff]  ;;  %v262_v16 = vld [vmem:[#allocation6 + $0x1f0] sm:$0xff] }
  0x51   :  { %154 = vmatpush1.msra.mxu0 %v107_v4  ;;  %v104_v9 = vld [vmem:[#allocation2 + $0x8] sm:$0xff]  ;;  %350 = vmatprep.subr.mxu1 %v261_v7  ;;  %v102_v14 = vld [vmem:[%s1960_s0] sm:$0xff]  ;;  %v258_v20 = vld [vmem:[#allocation6 + $0x1d0] sm:$0xff] }
  0x52   :  { %v257_v10 = vld [vmem:[#allocation6 + $0x1c8] sm:$0xff]  ;;  %155 = vmatprep.subr.mxu0 %v106_v5  ;;  %351 = vmatpush1.msra.mxu1 %v260_v8  ;;  %v256_v12 = vld [vmem:[#allocation6 + $0x1c0] sm:$0xff]  ;;  %v259_v18 = vld [vmem:[#allocation6 + $0x1d8] sm:$0xff] }
  0x53   :  { %v253_v13 = vld [vmem:[#allocation6 + $0x1a8] sm:$0xff]  ;;  %156 = vmatpush1.msra.mxu0 %v105_v6  ;;  %352 = vmatprep.subr.mxu1 %v257_v10  ;;  %v252_v17 = vld [vmem:[#allocation6 + $0x1a0] sm:$0xff]  ;;  %v255_v22 = vld [vmem:[#allocation6 + $0x1b8] sm:$0xff] }
  0x54   :  { %157 = vmatprep.subr.mxu0 %v104_v9  ;;  %353 = vmatpush1.msra.mxu1 %v256_v12  ;;  %v249_v19 = vld [vmem:[#allocation6 + $0x188] sm:$0xff]  ;;  %v248_v21 = vld [vmem:[#allocation6 + $0x180] sm:$0xff]  ;;  %v254_v24 = vld [vmem:[#allocation6 + $0x1b0] sm:$0xff] }
  0x55   :  { %158 = vmatpush1.msra.mxu0 %v103_v11  ;;  %354 = vmatprep.subr.mxu1 %v253_v13  ;;  %v245_v23 = vld [vmem:[#allocation6 + $0x168] sm:$0xff]  ;;  %v244_v25 = vld [vmem:[#allocation6 + $0x160] sm:$0xff]  ;;  %v251_v26 = vld [vmem:[#allocation6 + $0x198] sm:$0xff] }
  0x56   :  { %1642 = vmatmul.mubr.msk.f32.vlgmr.msra.gmra.mxu0 %vm123_vm0, %v102_v14  ;;  %421 = vmatprep.subr.mxu0 %v263_v15  ;;  %v241_v27 = vld [vmem:[#allocation6 + $0x148] sm:$0xff]  ;;  %v250_v28 = vld [vmem:[#allocation6 + $0x190] sm:$0xff]  ;;  %v240_v29 = vld [vmem:[#allocation6 + $0x140] sm:$0xff] }
  0x57   :  { %422 = vmatpush1.msra.mxu0 %v262_v16  ;;  %355 = vmatpush1.msra.mxu1 %v252_v17  ;;  %v247_v30 = vld [vmem:[#allocation6 + $0x178] sm:$0xff]  ;;  %v237_v31 = vld [vmem:[#allocation6 + $0x128] sm:$0xff]  ;;  %v246_v32 = vld [vmem:[#allocation6 + $0x170] sm:$0xff] }
  0x58   :  { %423 = vmatprep.subr.mxu0 %v259_v18  ;;  %356 = vmatprep.subr.mxu1 %v249_v19  ;;  %v236_v33 = vld [vmem:[#allocation6 + $0x120] sm:$0xff]  ;;  %v243_v34 = vld [vmem:[#allocation6 + $0x158] sm:$0xff]  ;;  %v233_v35 = vld [vmem:[#allocation6 + $0x108] sm:$0xff] }
  0x59   :  { %424 = vmatpush1.msra.mxu0 %v258_v20  ;;  %357 = vmatpush1.msra.mxu1 %v248_v21  ;;  %v242_v36 = vld [vmem:[#allocation6 + $0x150] sm:$0xff]  ;;  %v232_v37 = vld [vmem:[#allocation6 + $0x100] sm:$0xff]  ;;  %v239_v38 = vld [vmem:[#allocation6 + $0x138] sm:$0xff] }
  0x5a   :  { %425 = vmatprep.subr.mxu0 %v255_v22  ;;  %358 = vmatprep.subr.mxu1 %v245_v23  ;;  %v229_v39 = vld [vmem:[#allocation6 + $0xe8] sm:$0xff]  ;;  %v238_v40 = vld [vmem:[#allocation6 + $0x130] sm:$0xff]  ;;  %v228_v41 = vld [vmem:[#allocation6 + $0xe0] sm:$0xff] }
  0x5b   :  { %426 = vmatpush1.msra.mxu0 %v254_v24  ;;  %359 = vmatpush1.msra.mxu1 %v244_v25  ;;  %v235_v42 = vld [vmem:[#allocation6 + $0x118] sm:$0xff]  ;;  %v225_v43 = vld [vmem:[#allocation6 + $0xc8] sm:$0xff]  ;;  %v234_v44 = vld [vmem:[#allocation6 + $0x110] sm:$0xff] }
  0x5c   :  { %427 = vmatprep.subr.mxu0 %v251_v26  ;;  %360 = vmatprep.subr.mxu1 %v241_v27  ;;  %v224_v45 = vld [vmem:[#allocation6 + $0xc0] sm:$0xff]  ;;  %v231_v46 = vld [vmem:[#allocation6 + $0xf8] sm:$0xff]  ;;  %v221_v47 = vld [vmem:[#allocation6 + $0xa8] sm:$0xff] }
  0x5d   :  { %428 = vmatpush1.msra.mxu0 %v250_v28  ;;  %361 = vmatpush1.msra.mxu1 %v240_v29  ;;  %v230_v48 = vld [vmem:[#allocation6 + $0xf0] sm:$0xff]  ;;  %v220_v49 = vld [vmem:[#allocation6 + $0xa0] sm:$0xff]  ;;  %v227_v50 = vld [vmem:[#allocation6 + $0xd8] sm:$0xff] }
  0x5e   :  { %429 = vmatprep.subr.mxu0 %v247_v30  ;;  %362 = vmatprep.subr.mxu1 %v237_v31  ;;  %v217_v51 = vld [vmem:[#allocation6 + $0x88] sm:$0xff]  ;;  %v226_v52 = vld [vmem:[#allocation6 + $0xd0] sm:$0xff]  ;;  %v216_v53 = vld [vmem:[#allocation6 + $0x80] sm:$0xff] }
  0x5f   :  { %430 = vmatpush1.msra.mxu0 %v246_v32  ;;  %363 = vmatpush1.msra.mxu1 %v236_v33  ;;  %v223_v54 = vld [vmem:[#allocation6 + $0xb8] sm:$0xff]  ;;  %v213_v55 = vld [vmem:[#allocation6 + $0x68] sm:$0xff]  ;;  %v222_v56 = vld [vmem:[#allocation6 + $0xb0] sm:$0xff] }
  0x60   :  { %431 = vmatprep.subr.mxu0 %v243_v34  ;;  %364 = vmatprep.subr.mxu1 %v233_v35  ;;  %v212_v57 = vld [vmem:[#allocation6 + $0x60] sm:$0xff]  ;;  %v219_v58 = vld [vmem:[#allocation6 + $0x98] sm:$0xff]  ;;  %v209_v59 = vld [vmem:[#allocation6 + $0x48] sm:$0xff] }
  0x61   :  { %432 = vmatpush1.msra.mxu0 %v242_v36  ;;  %365 = vmatpush1.msra.mxu1 %v232_v37  ;;  %v218_v60 = vld [vmem:[#allocation6 + $0x90] sm:$0xff]  ;;  %v208_v61 = vld [vmem:[#allocation6 + $0x40] sm:$0xff]  ;;  %v215_v62 = vld [vmem:[#allocation6 + $0x78] sm:$0xff] }
  0x62   :  { %433 = vmatprep.subr.mxu0 %v239_v38  ;;  %366 = vmatprep.subr.mxu1 %v229_v39  ;;  %v205_v63 = vld [vmem:[#allocation6 + $0x28] sm:$0xff]  ;;  %v214_v0 = vld [vmem:[#allocation6 + $0x70] sm:$0xff]  ;;  %v204_v1 = vld [vmem:[#allocation6 + $0x20] sm:$0xff] }
  0x63   :  { %434 = vmatpush1.msra.mxu0 %v238_v40  ;;  %367 = vmatpush1.msra.mxu1 %v228_v41  ;;  %v211_v2 = vld [vmem:[#allocation6 + $0x58] sm:$0xff]  ;;  %v201_v3 = vld [vmem:[#allocation6 + $0x8] sm:$0xff]  ;;  %v210_v4 = vld [vmem:[#allocation6 + $0x50] sm:$0xff] }
  0x64   :  { %435 = vmatprep.subr.mxu0 %v235_v42  ;;  %368 = vmatprep.subr.mxu1 %v225_v43  ;;  %v200_v5 = vld [vmem:[#allocation6] sm:$0xff]  ;;  %v207_v6 = vld [vmem:[#allocation6 + $0x38] sm:$0xff]  ;;  %v325_v7 = vld [vmem:[#allocation6 + $0x3e8] sm:$0xff] }
  0x65   :  { %436 = vmatpush1.msra.mxu0 %v234_v44  ;;  %369 = vmatpush1.msra.mxu1 %v224_v45  ;;  %v206_v8 = vld [vmem:[#allocation6 + $0x30] sm:$0xff]  ;;  %v324_v9 = vld [vmem:[#allocation6 + $0x3e0] sm:$0xff]  ;;  %v203_v10 = vld [vmem:[#allocation6 + $0x18] sm:$0xff] }
  0x66   :  { %437 = vmatprep.subr.mxu0 %v231_v46  ;;  %370 = vmatprep.subr.mxu1 %v221_v47  ;;  %v321_v11 = vld [vmem:[#allocation6 + $0x3c8] sm:$0xff]  ;;  %v202_v12 = vld [vmem:[#allocation6 + $0x10] sm:$0xff]  ;;  %v320_v13 = vld [vmem:[#allocation6 + $0x3c0] sm:$0xff] }
  0x67   :  { %438 = vmatpush1.msra.mxu0 %v230_v48  ;;  %371 = vmatpush1.msra.mxu1 %v220_v49  ;;  %v327_v14 = vld [vmem:[#allocation6 + $0x3f8] sm:$0xff]  ;;  %v317_v15 = vld [vmem:[#allocation6 + $0x3a8] sm:$0xff]  ;;  %v326_v16 = vld [vmem:[#allocation6 + $0x3f0] sm:$0xff] }
  0x68   :  { %439 = vmatprep.subr.mxu0 %v227_v50  ;;  %372 = vmatprep.subr.mxu1 %v217_v51  ;;  %v316_v17 = vld [vmem:[#allocation6 + $0x3a0] sm:$0xff]  ;;  %v323_v18 = vld [vmem:[#allocation6 + $0x3d8] sm:$0xff]  ;;  %v313_v19 = vld [vmem:[#allocation6 + $0x388] sm:$0xff] }
  0x69   :  { %440 = vmatpush1.msra.mxu0 %v226_v52  ;;  %373 = vmatpush1.msra.mxu1 %v216_v53  ;;  %v322_v20 = vld [vmem:[#allocation6 + $0x3d0] sm:$0xff]  ;;  %v312_v21 = vld [vmem:[#allocation6 + $0x380] sm:$0xff]  ;;  %v319_v22 = vld [vmem:[#allocation6 + $0x3b8] sm:$0xff] }
  0x6a   :  { %441 = vmatprep.subr.mxu0 %v223_v54  ;;  %374 = vmatprep.subr.mxu1 %v213_v55  ;;  %v309_v23 = vld [vmem:[#allocation6 + $0x368] sm:$0xff]  ;;  %v318_v24 = vld [vmem:[#allocation6 + $0x3b0] sm:$0xff]  ;;  %v308_v25 = vld [vmem:[#allocation6 + $0x360] sm:$0xff] }
  0x6b   :  { %442 = vmatpush1.msra.mxu0 %v222_v56  ;;  %375 = vmatpush1.msra.mxu1 %v212_v57  ;;  %v315_v26 = vld [vmem:[#allocation6 + $0x398] sm:$0xff]  ;;  %v305_v27 = vld [vmem:[#allocation6 + $0x348] sm:$0xff]  ;;  %v314_v28 = vld [vmem:[#allocation6 + $0x390] sm:$0xff] }
  0x6c   :  { %443 = vmatprep.subr.mxu0 %v219_v58  ;;  %376 = vmatprep.subr.mxu1 %v209_v59  ;;  %v304_v29 = vld [vmem:[#allocation6 + $0x340] sm:$0xff]  ;;  %v311_v30 = vld [vmem:[#allocation6 + $0x378] sm:$0xff]  ;;  %v301_v31 = vld [vmem:[#allocation6 + $0x328] sm:$0xff] }
  0x6d   :  { %444 = vmatpush1.msra.mxu0 %v218_v60  ;;  %377 = vmatpush1.msra.mxu1 %v208_v61  ;;  %v310_v32 = vld [vmem:[#allocation6 + $0x370] sm:$0xff]  ;;  %v300_v33 = vld [vmem:[#allocation6 + $0x320] sm:$0xff]  ;;  %v307_v34 = vld [vmem:[#allocation6 + $0x358] sm:$0xff] }
  0x6e   :  { %445 = vmatprep.subr.mxu0 %v215_v62  ;;  %378 = vmatprep.subr.mxu1 %v205_v63  ;;  %v297_v35 = vld [vmem:[#allocation6 + $0x308] sm:$0xff]  ;;  %v306_v36 = vld [vmem:[#allocation6 + $0x350] sm:$0xff]  ;;  %v296_v37 = vld [vmem:[#allocation6 + $0x300] sm:$0xff] }
  0x6f   :  { %446 = vmatpush1.msra.mxu0 %v214_v0  ;;  %379 = vmatpush1.msra.mxu1 %v204_v1  ;;  %v303_v38 = vld [vmem:[#allocation6 + $0x338] sm:$0xff]  ;;  %v293_v39 = vld [vmem:[#allocation6 + $0x2e8] sm:$0xff]  ;;  %v302_v40 = vld [vmem:[#allocation6 + $0x330] sm:$0xff] }
  0x70   :  { %447 = vmatprep.subr.mxu0 %v211_v2  ;;  %380 = vmatprep.subr.mxu1 %v201_v3  ;;  %v292_v41 = vld [vmem:[#allocation6 + $0x2e0] sm:$0xff]  ;;  %v299_v42 = vld [vmem:[#allocation6 + $0x318] sm:$0xff]  ;;  %v289_v43 = vld [vmem:[#allocation6 + $0x2c8] sm:$0xff] }
  0x71   :  { %448 = vmatpush1.msra.mxu0 %v210_v4  ;;  %381 = vmatpush1.msra.mxu1 %v200_v5  ;;  %v298_v44 = vld [vmem:[#allocation6 + $0x310] sm:$0xff]  ;;  %v288_v45 = vld [vmem:[#allocation6 + $0x2c0] sm:$0xff]  ;;  %v295_v46 = vld [vmem:[#allocation6 + $0x2f8] sm:$0xff] }
  0x72   :  { %449 = vmatprep.subr.mxu0 %v207_v6  ;;  %382 = vmatprep.subr.mxu1 %v325_v7  ;;  %v285_v47 = vld [vmem:[#allocation6 + $0x2a8] sm:$0xff]  ;;  %v294_v48 = vld [vmem:[#allocation6 + $0x2f0] sm:$0xff]  ;;  %v284_v49 = vld [vmem:[#allocation6 + $0x2a0] sm:$0xff] }
  0x73   :  { %450 = vmatpush1.msra.mxu0 %v206_v8  ;;  %383 = vmatpush2.msra.mxu1 %v324_v9  ;;  %v291_v50 = vld [vmem:[#allocation6 + $0x2d8] sm:$0xff]  ;;  %v281_v51 = vld [vmem:[#allocation6 + $0x288] sm:$0xff]  ;;  %v290_v52 = vld [vmem:[#allocation6 + $0x2d0] sm:$0xff] }
  0x74   :  { %451 = vmatprep.subr.mxu0 %v203_v10  ;;  %384 = vmatprep.subr.mxu1 %v321_v11  ;;  %v280_v53 = vld [vmem:[#allocation6 + $0x280] sm:$0xff]  ;;  %v287_v54 = vld [vmem:[#allocation6 + $0x2b8] sm:$0xff]  ;;  %v286_v55 = vld [vmem:[#allocation6 + $0x2b0] sm:$0xff] }
  0x75   :  { %452 = vmatpush1.msra.mxu0 %v202_v12  ;;  %385 = vmatpush2.msra.mxu1 %v320_v13  ;;  %v283_v56 = vld [vmem:[#allocation6 + $0x298] sm:$0xff]  ;;  %v282_v57 = vld [vmem:[#allocation6 + $0x290] sm:$0xff]  ;;  %v277_v58 = vld [vmem:[#allocation6 + $0x268] sm:$0xff]  ;;  %v113_v12 = vlaneseq }
  0x76   :  { %453 = vmatprep.subr.mxu0 %v327_v14  ;;  %386 = vmatprep.subr.mxu1 %v317_v15  ;;  %v279_v59 = vld [vmem:[#allocation6 + $0x278] sm:$0xff]  ;;  %v276_v60 = vld [vmem:[#allocation6 + $0x260] sm:$0xff]  ;;  %v278_v61 = vld [vmem:[#allocation6 + $0x270] sm:$0xff] }
  0x77   :  { %454 = vmatpush2.msra.mxu0 %v326_v16  ;;  %387 = vmatpush2.msra.mxu1 %v316_v17  ;;  %v273_v62 = vld [vmem:[#allocation6 + $0x248] sm:$0xff]  ;;  %v275_v63 = vld [vmem:[#allocation6 + $0x258] sm:$0xff]  ;;  %v272_v0 = vld [vmem:[#allocation6 + $0x240] sm:$0xff]  ;;  %v1874_v13 = vshrl.u32 %v113_v12, 7 }
  0x78   :  { %455 = vmatprep.subr.mxu0 %v323_v18  ;;  %388 = vmatprep.subr.mxu1 %v313_v19  ;;  %v274_v1 = vld [vmem:[#allocation6 + $0x250] sm:$0xff]  ;;  %v269_v2 = vld [vmem:[#allocation6 + $0x228] sm:$0xff]  ;;  %v271_v3 = vld [vmem:[#allocation6 + $0x238] sm:$0xff] }
  0x79   :  { %456 = vmatpush2.msra.mxu0 %v322_v20  ;;  %389 = vmatpush2.msra.mxu1 %v312_v21  ;;  %v268_v4 = vld [vmem:[#allocation6 + $0x220] sm:$0xff]  ;;  %v270_v5 = vld [vmem:[#allocation6 + $0x230] sm:$0xff]  ;;  %v265_v6 = vld [vmem:[#allocation6 + $0x208] sm:$0xff]  ;;  %v1877_v14 = vsub.s32 0, %v1874_v13  ;;  %v1880_v16 = vsub.s32 1, %v1874_v13 }
  0x7a   :  { %457 = vmatprep.subr.mxu0 %v319_v22  ;;  %390 = vmatprep.subr.mxu1 %v309_v23  ;;  %v267_v7 = vld [vmem:[#allocation6 + $0x218] sm:$0xff]  ;;  %v264_v8 = vld [vmem:[#allocation6 + $0x200] sm:$0xff]  ;;  %v266_v9 = vld [vmem:[#allocation6 + $0x210] sm:$0xff] }
  0x7b   :  { %458 = vmatpush2.msra.mxu0 %v318_v24  ;;  %391 = vmatpush2.msra.mxu1 %v308_v25  ;;  %v617_v10 = vld [vmem:[#allocation9 + $0x3c8] sm:$0xff]  ;;  %v111_v15 = vld [vmem:[#allocation4] sm:$0x3]  ;;  %v616_v25 = vld [vmem:[#allocation9 + $0x3c0] sm:$0xff] }
  0x7c   :  { %459 = vmatprep.subr.mxu0 %v315_v26  ;;  %392 = vmatprep.subr.mxu1 %v305_v27  ;;  %v873_v11 = vld [vmem:[#allocation9 + $0xbc8] sm:$0xff]  ;;  %v116_v17 = vrot.slane %v111_v15, %v1877_v14  ;;  %v120_v18 = vrot.slane %v111_v15, %v1880_v16  ;;  %v872_v26 = vld [vmem:[#allocation9 + $0xbc0] sm:$0xff] }
  0x7d   :  { %460 = vmatpush2.msra.mxu0 %v314_v28  ;;  %393 = vmatpush2.msra.mxu1 %v304_v29  ;;  %v609_v27 = vld [vmem:[#allocation9 + $0x388] sm:$0xff]  ;;  %v608_v29 = vld [vmem:[#allocation9 + $0x380] sm:$0xff] }
  0x7e   :  { %461 = vmatprep.subr.mxu0 %v311_v30  ;;  %394 = vmatprep.subr.mxu1 %v301_v31  ;;  %v865_v28 = vld [vmem:[#allocation9 + $0xb88] sm:$0xff]  ;;  %v864_v30 = vld [vmem:[#allocation9 + $0xb80] sm:$0xff] }
  0x7f   :  { %462 = vmatpush2.msra.mxu0 %v310_v32  ;;  %395 = vmatpush2.msra.mxu1 %v300_v33  ;;  %v601_v31 = vld [vmem:[#allocation9 + $0x348] sm:$0xff]  ;;  %v600_v33 = vld [vmem:[#allocation9 + $0x340] sm:$0xff] }
  0x80   :  { %463 = vmatprep.subr.mxu0 %v307_v34  ;;  %396 = vmatprep.subr.mxu1 %v297_v35  ;;  %v857_v32 = vld [vmem:[#allocation9 + $0xb48] sm:$0xff]  ;;  %v856_v34 = vld [vmem:[#allocation9 + $0xb40] sm:$0xff] }
  0x81   :  { %464 = vmatpush2.msra.mxu0 %v306_v36  ;;  %397 = vmatpush2.msra.mxu1 %v296_v37  ;;  %v593_v35 = vld [vmem:[#allocation9 + $0x308] sm:$0xff]  ;;  %v592_v37 = vld [vmem:[#allocation9 + $0x300] sm:$0xff] }
  0x82   :  { %465 = vmatprep.subr.mxu0 %v303_v38  ;;  %398 = vmatprep.subr.mxu1 %v293_v39  ;;  %v849_v36 = vld [vmem:[#allocation9 + $0xb08] sm:$0xff]  ;;  %v848_v38 = vld [vmem:[#allocation9 + $0xb00] sm:$0xff] }
  0x83   :  { %466 = vmatpush2.msra.mxu0 %v302_v40  ;;  %399 = vmatpush2.msra.mxu1 %v292_v41  ;;  %v585_v39 = vld [vmem:[#allocation9 + $0x2c8] sm:$0xff]  ;;  %v584_v41 = vld [vmem:[#allocation9 + $0x2c0] sm:$0xff] }
  0x84   :  { %467 = vmatprep.subr.mxu0 %v299_v42  ;;  %400 = vmatprep.subr.mxu1 %v289_v43  ;;  %v841_v40 = vld [vmem:[#allocation9 + $0xac8] sm:$0xff]  ;;  %v840_v42 = vld [vmem:[#allocation9 + $0xac0] sm:$0xff] }
  0x85   :  { %468 = vmatpush2.msra.mxu0 %v298_v44  ;;  %401 = vmatpush2.msra.mxu1 %v288_v45  ;;  %v577_v43 = vld [vmem:[#allocation9 + $0x288] sm:$0xff]  ;;  %v576_v45 = vld [vmem:[#allocation9 + $0x280] sm:$0xff] }
  0x86   :  { %469 = vmatprep.subr.mxu0 %v295_v46  ;;  %402 = vmatprep.subr.mxu1 %v285_v47  ;;  %v833_v44 = vld [vmem:[#allocation9 + $0xa88] sm:$0xff]  ;;  %v832_v46 = vld [vmem:[#allocation9 + $0xa80] sm:$0xff] }
  0x87   :  { %470 = vmatpush2.msra.mxu0 %v294_v48  ;;  %403 = vmatpush2.msra.mxu1 %v284_v49  ;;  %v569_v47 = vld [vmem:[#allocation9 + $0x248] sm:$0xff]  ;;  %v568_v49 = vld [vmem:[#allocation9 + $0x240] sm:$0xff] }
  0x88   :  { %471 = vmatprep.subr.mxu0 %v291_v50  ;;  %404 = vmatprep.subr.mxu1 %v281_v51  ;;  %v825_v48 = vld [vmem:[#allocation9 + $0xa48] sm:$0xff]  ;;  %v824_v50 = vld [vmem:[#allocation9 + $0xa40] sm:$0xff] }
  0x89   :  { %472 = vmatpush2.msra.mxu0 %v290_v52  ;;  %405 = vmatpush2.msra.mxu1 %v280_v53  ;;  %v561_v51 = vld [vmem:[#allocation9 + $0x208] sm:$0xff]  ;;  %v560_v53 = vld [vmem:[#allocation9 + $0x200] sm:$0xff] }
  0x8a   :  { %473 = vmatprep.subr.mxu0 %v287_v54  ;;  %406 = vmatprep.subr.mxu1 %v277_v58  ;;  %v817_v52 = vld [vmem:[#allocation9 + $0xa08] sm:$0xff]  ;;  %v816_v54 = vld [vmem:[#allocation9 + $0xa00] sm:$0xff] }
  0x8b   :  { %474 = vmatpush2.msra.mxu0 %v286_v55  ;;  %407 = vmatpush2.msra.mxu1 %v276_v60  ;;  %v553_v55 = vld [vmem:[#allocation9 + $0x1c8] sm:$0xff]  ;;  %v808_v58 = vld [vmem:[#allocation9 + $0x9c0] sm:$0xff] }
  0x8c   :  { %475 = vmatprep.subr.mxu0 %v283_v56  ;;  %408 = vmatprep.subr.mxu1 %v273_v62  ;;  %v809_v56 = vld [vmem:[#allocation9 + $0x9c8] sm:$0xff]  ;;  %v800_v62 = vld [vmem:[#allocation9 + $0x980] sm:$0xff] }
  0x8d   :  { %476 = vmatpush2.msra.mxu0 %v282_v57  ;;  %409 = vmatpush2.msra.mxu1 %v272_v0  ;;  %v552_v57 = vld [vmem:[#allocation9 + $0x1c0] sm:$0xff]  ;;  %v801_v60 = vld [vmem:[#allocation9 + $0x988] sm:$0xff] }
  0x8e   :  { %477 = vmatprep.subr.mxu0 %v279_v59  ;;  %410 = vmatprep.subr.mxu1 %v269_v2  ;;  %v545_v59 = vld [vmem:[#allocation9 + $0x188] sm:$0xff]  ;;  %v792_v2 = vld [vmem:[#allocation9 + $0x940] sm:$0xff] }
  0x8f   :  { %478 = vmatpush2.msra.mxu0 %v278_v61  ;;  %411 = vmatpush2.msra.mxu1 %v268_v4  ;;  %v544_v61 = vld [vmem:[#allocation9 + $0x180] sm:$0xff]  ;;  %v793_v0 = vld [vmem:[#allocation9 + $0x948] sm:$0xff] }
  0x90   :  { %479 = vmatprep.subr.mxu0 %v275_v63  ;;  %412 = vmatprep.subr.mxu1 %v265_v6  ;;  %v537_v63 = vld [vmem:[#allocation9 + $0x148] sm:$0xff]  ;;  %v784_v6 = vld [vmem:[#allocation9 + $0x900] sm:$0xff] }
  0x91   :  { %480 = vmatpush2.msra.mxu0 %v274_v1  ;;  %413 = vmatpush2.msra.mxu1 %v264_v8  ;;  %v536_v1 = vld [vmem:[#allocation9 + $0x140] sm:$0xff]  ;;  %v785_v4 = vld [vmem:[#allocation9 + $0x908] sm:$0xff] }
  0x92   :  { %481 = vmatprep.subr.mxu0 %v271_v3  ;;  %1050 = vmatprep.subr.mxu1 %v617_v10  ;;  %v529_v3 = vld [vmem:[#allocation9 + $0x108] sm:$0xff]  ;;  %v776_v10 = vld [vmem:[#allocation9 + $0x8c0] sm:$0xff] }
  0x93   :  { %482 = vmatpush2.msra.mxu0 %v270_v5  ;;  %v528_v5 = vld [vmem:[#allocation9 + $0x100] sm:$0xff]  ;;  %v777_v8 = vld [vmem:[#allocation9 + $0x8c8] sm:$0xff] }
  0x94   :  { %483 = vmatprep.subr.mxu0 %v267_v7  ;;  %v521_v7 = vld [vmem:[#allocation9 + $0xc8] sm:$0xff]  ;;  %v512_v15 = vld [vmem:[#allocation9 + $0x80] sm:$0xff] }
  0x95   :  { %484 = vmatpush2.msra.mxu0 %v266_v9  ;;  %v520_v9 = vld [vmem:[#allocation9 + $0xc0] sm:$0xff]  ;;  %v769_v12 = vld [vmem:[#allocation9 + $0x888] sm:$0xff] }
  0x96   :  { %1121 = vmatprep.subr.mxu0 %v873_v11  ;;  %v513_v11 = vld [vmem:[#allocation9 + $0x88] sm:$0xff] }
 0x116   :  { %v193_v19 = vpop.f32.mrf.mxu0 }
 0x117   :  { %v194_v20 = vadd.f32 %v193_v19, %v116_v17  ;;  %v768_v17 = vld [vmem:[#allocation9 + $0x880] sm:$0xff]  ;;  %v761_v19 = vld [vmem:[#allocation9 + $0x848] sm:$0xff] }
 0x118   :  { %v195_v21 = vpop.f32.mrf.mxu0 }
 0x119   :  { %v196_v22 = vadd.f32 %v195_v21, %v120_v18  ;;  %v198_v24 = vmax.f32 %v194_v20, 0.0  ;;  %v505_v18 = vld [vmem:[#allocation9 + $0x48] sm:$0xff]  ;;  %v504_v20 = vld [vmem:[#allocation9 + $0x40] sm:$0xff] }
 0x11a   :  { %v760_v21 = vld [vmem:[#allocation9 + $0x840] sm:$0xff] }
 0x11b   :  { %v199_v23 = vmax.f32 %v196_v22, 0.0  ;;  %v497_v22 = vld [vmem:[#allocation9 + $0x8] sm:$0xff] }
 0x11d   :  { %414 = vmatprep.mubr.f32.mxu1 %v199_v23  ;;  %485 = vmatprep.mubr.f32.mxu0 %v199_v23  ;;  %v753_v23 = vld [vmem:[#allocation9 + $0x808] sm:$0xff] }
 0x11e   :  { %415 = vmatmul.mubr.f32.vlgmr.msra.gmra.mxu1 %v198_v24  ;;  %486 = vmatmul.mubr.f32.vlgmr.msra.gmra.mxu0 %v198_v24  ;;  %v496_v24 = vld [vmem:[#allocation9] sm:$0xff] }
 0x11f   :  { %1051 = vmatpush1.msra.mxu1 %v616_v25  ;;  %1122 = vmatpush1.msra.mxu0 %v872_v26  ;;  %v752_v25 = vld [vmem:[#allocation9 + $0x800] sm:$0xff]  ;;  %v745_v26 = vld [vmem:[#allocation9 + $0x7c8] sm:$0xff] }
 0x120   :  { %1052 = vmatprep.subr.mxu1 %v609_v27  ;;  %1123 = vmatprep.subr.mxu0 %v865_v28  ;;  %v1001_v27 = vld [vmem:[#allocation9 + $0xfc8] sm:$0xff]  ;;  %v744_v28 = vld [vmem:[#allocation9 + $0x7c0] sm:$0xff] }
 0x121   :  { %1053 = vmatpush1.msra.mxu1 %v608_v29  ;;  %1124 = vmatpush1.msra.mxu0 %v864_v30  ;;  %v1000_v29 = vld [vmem:[#allocation9 + $0xfc0] sm:$0xff]  ;;  %v737_v30 = vld [vmem:[#allocation9 + $0x788] sm:$0xff] }
 0x122   :  { %1054 = vmatprep.subr.mxu1 %v601_v31  ;;  %1125 = vmatprep.subr.mxu0 %v857_v32  ;;  %v993_v31 = vld [vmem:[#allocation9 + $0xf88] sm:$0xff]  ;;  %v736_v32 = vld [vmem:[#allocation9 + $0x780] sm:$0xff] }
 0x123   :  { %1055 = vmatpush1.msra.mxu1 %v600_v33  ;;  %1126 = vmatpush1.msra.mxu0 %v856_v34  ;;  %v992_v33 = vld [vmem:[#allocation9 + $0xf80] sm:$0xff]  ;;  %v729_v34 = vld [vmem:[#allocation9 + $0x748] sm:$0xff] }
 0x124   :  { %1056 = vmatprep.subr.mxu1 %v593_v35  ;;  %1127 = vmatprep.subr.mxu0 %v849_v36  ;;  %v985_v35 = vld [vmem:[#allocation9 + $0xf48] sm:$0xff]  ;;  %v728_v36 = vld [vmem:[#allocation9 + $0x740] sm:$0xff] }
 0x125   :  { %1057 = vmatpush1.msra.mxu1 %v592_v37  ;;  %1128 = vmatpush1.msra.mxu0 %v848_v38  ;;  %v984_v37 = vld [vmem:[#allocation9 + $0xf40] sm:$0xff]  ;;  %v721_v38 = vld [vmem:[#allocation9 + $0x708] sm:$0xff] }
 0x126   :  { %1058 = vmatprep.subr.mxu1 %v585_v39  ;;  %1129 = vmatprep.subr.mxu0 %v841_v40  ;;  %v977_v39 = vld [vmem:[#allocation9 + $0xf08] sm:$0xff]  ;;  %v720_v40 = vld [vmem:[#allocation9 + $0x700] sm:$0xff] }
 0x127   :  { %1059 = vmatpush1.msra.mxu1 %v584_v41  ;;  %1130 = vmatpush1.msra.mxu0 %v840_v42  ;;  %v976_v41 = vld [vmem:[#allocation9 + $0xf00] sm:$0xff]  ;;  %v713_v42 = vld [vmem:[#allocation9 + $0x6c8] sm:$0xff] }
 0x128   :  { %1060 = vmatprep.subr.mxu1 %v577_v43  ;;  %1131 = vmatprep.subr.mxu0 %v833_v44  ;;  %v969_v43 = vld [vmem:[#allocation9 + $0xec8] sm:$0xff]  ;;  %v712_v44 = vld [vmem:[#allocation9 + $0x6c0] sm:$0xff] }
 0x129   :  { %1061 = vmatpush1.msra.mxu1 %v576_v45  ;;  %1132 = vmatpush1.msra.mxu0 %v832_v46  ;;  %v968_v45 = vld [vmem:[#allocation9 + $0xec0] sm:$0xff]  ;;  %v705_v46 = vld [vmem:[#allocation9 + $0x688] sm:$0xff] }
 0x12a   :  { %1062 = vmatprep.subr.mxu1 %v569_v47  ;;  %1133 = vmatprep.subr.mxu0 %v825_v48  ;;  %v961_v47 = vld [vmem:[#allocation9 + $0xe88] sm:$0xff]  ;;  %v704_v48 = vld [vmem:[#allocation9 + $0x680] sm:$0xff] }
 0x12b   :  { %1063 = vmatpush1.msra.mxu1 %v568_v49  ;;  %1134 = vmatpush1.msra.mxu0 %v824_v50  ;;  %v960_v49 = vld [vmem:[#allocation9 + $0xe80] sm:$0xff]  ;;  %v697_v50 = vld [vmem:[#allocation9 + $0x648] sm:$0xff] }
 0x12c   :  { %1064 = vmatprep.subr.mxu1 %v561_v51  ;;  %1135 = vmatprep.subr.mxu0 %v817_v52  ;;  %v953_v51 = vld [vmem:[#allocation9 + $0xe48] sm:$0xff]  ;;  %v696_v52 = vld [vmem:[#allocation9 + $0x640] sm:$0xff] }
 0x12d   :  { %1065 = vmatpush1.msra.mxu1 %v560_v53  ;;  %1136 = vmatpush1.msra.mxu0 %v816_v54  ;;  %v952_v53 = vld [vmem:[#allocation9 + $0xe40] sm:$0xff]  ;;  %v689_v54 = vld [vmem:[#allocation9 + $0x608] sm:$0xff] }
 0x12e   :  { %1066 = vmatprep.subr.mxu1 %v553_v55  ;;  %1137 = vmatprep.subr.mxu0 %v809_v56  ;;  %v945_v55 = vld [vmem:[#allocation9 + $0xe08] sm:$0xff]  ;;  %v688_v56 = vld [vmem:[#allocation9 + $0x600] sm:$0xff] }
 0x12f   :  { %1067 = vmatpush1.msra.mxu1 %v552_v57  ;;  %1138 = vmatpush1.msra.mxu0 %v808_v58  ;;  %v944_v57 = vld [vmem:[#allocation9 + $0xe00] sm:$0xff]  ;;  %v681_v58 = vld [vmem:[#allocation9 + $0x5c8] sm:$0xff] }
 0x130   :  { %1068 = vmatprep.subr.mxu1 %v545_v59  ;;  %1139 = vmatprep.subr.mxu0 %v801_v60  ;;  %v937_v59 = vld [vmem:[#allocation9 + $0xdc8] sm:$0xff]  ;;  %v680_v60 = vld [vmem:[#allocation9 + $0x5c0] sm:$0xff] }
 0x131   :  { %1069 = vmatpush1.msra.mxu1 %v544_v61  ;;  %1140 = vmatpush1.msra.mxu0 %v800_v62  ;;  %v936_v61 = vld [vmem:[#allocation9 + $0xdc0] sm:$0xff]  ;;  %v673_v62 = vld [vmem:[#allocation9 + $0x588] sm:$0xff] }
 0x132   :  { %1070 = vmatprep.subr.mxu1 %v537_v63  ;;  %1141 = vmatprep.subr.mxu0 %v793_v0  ;;  %v929_v63 = vld [vmem:[#allocation9 + $0xd88] sm:$0xff]  ;;  %v672_v0 = vld [vmem:[#allocation9 + $0x580] sm:$0xff] }
 0x133   :  { %1071 = vmatpush1.msra.mxu1 %v536_v1  ;;  %1142 = vmatpush1.msra.mxu0 %v792_v2  ;;  %v928_v1 = vld [vmem:[#allocation9 + $0xd80] sm:$0xff]  ;;  %v665_v2 = vld [vmem:[#allocation9 + $0x548] sm:$0xff] }
 0x134   :  { %1072 = vmatprep.subr.mxu1 %v529_v3  ;;  %1143 = vmatprep.subr.mxu0 %v785_v4  ;;  %v921_v3 = vld [vmem:[#allocation9 + $0xd48] sm:$0xff]  ;;  %v664_v4 = vld [vmem:[#allocation9 + $0x540] sm:$0xff] }
 0x135   :  { %1073 = vmatpush1.msra.mxu1 %v528_v5  ;;  %1144 = vmatpush1.msra.mxu0 %v784_v6  ;;  %v920_v5 = vld [vmem:[#allocation9 + $0xd40] sm:$0xff]  ;;  %v657_v6 = vld [vmem:[#allocation9 + $0x508] sm:$0xff] }
 0x136   :  { %1074 = vmatprep.subr.mxu1 %v521_v7  ;;  %1145 = vmatprep.subr.mxu0 %v777_v8  ;;  %v913_v7 = vld [vmem:[#allocation9 + $0xd08] sm:$0xff]  ;;  %v656_v8 = vld [vmem:[#allocation9 + $0x500] sm:$0xff] }
 0x137   :  { %1075 = vmatpush1.msra.mxu1 %v520_v9  ;;  %1146 = vmatpush1.msra.mxu0 %v776_v10  ;;  %v912_v9 = vld [vmem:[#allocation9 + $0xd00] sm:$0xff]  ;;  %v649_v10 = vld [vmem:[#allocation9 + $0x4c8] sm:$0xff] }
 0x138   :  { %1076 = vmatprep.subr.mxu1 %v513_v11  ;;  %1147 = vmatprep.subr.mxu0 %v769_v12  ;;  %v905_v11 = vld [vmem:[#allocation9 + $0xcc8] sm:$0xff]  ;;  %v648_v12 = vld [vmem:[#allocation9 + $0x4c0] sm:$0xff] }
 0x139   :  { %1077 = vmatpush1.msra.mxu1 %v512_v15  ;;  %1148 = vmatpush1.msra.mxu0 %v768_v17  ;;  %v904_v15 = vld [vmem:[#allocation9 + $0xcc0] sm:$0xff]  ;;  %v641_v17 = vld [vmem:[#allocation9 + $0x488] sm:$0xff] }
 0x13a   :  { %1078 = vmatprep.subr.mxu1 %v505_v18  ;;  %1149 = vmatprep.subr.mxu0 %v761_v19  ;;  %v897_v18 = vld [vmem:[#allocation9 + $0xc88] sm:$0xff]  ;;  %v640_v19 = vld [vmem:[#allocation9 + $0x480] sm:$0xff] }
 0x13b   :  { %1079 = vmatpush1.msra.mxu1 %v504_v20  ;;  %1150 = vmatpush1.msra.mxu0 %v760_v21  ;;  %v896_v20 = vld [vmem:[#allocation9 + $0xc80] sm:$0xff]  ;;  %v633_v21 = vld [vmem:[#allocation9 + $0x448] sm:$0xff] }
 0x13c   :  { %1080 = vmatprep.subr.mxu1 %v497_v22  ;;  %1151 = vmatprep.subr.mxu0 %v753_v23  ;;  %v889_v22 = vld [vmem:[#allocation9 + $0xc48] sm:$0xff]  ;;  %v632_v23 = vld [vmem:[#allocation9 + $0x440] sm:$0xff] }
 0x13d   :  { %1081 = vmatpush1.msra.mxu1 %v496_v24  ;;  %1152 = vmatpush1.msra.mxu0 %v752_v25  ;;  %v888_v24 = vld [vmem:[#allocation9 + $0xc40] sm:$0xff]  ;;  %v625_v25 = vld [vmem:[#allocation9 + $0x408] sm:$0xff] }
 0x13e   :  { %1082 = vmatprep.subr.mxu1 %v745_v26  ;;  %1153 = vmatprep.subr.mxu0 %v1001_v27  ;;  %v881_v26 = vld [vmem:[#allocation9 + $0xc08] sm:$0xff]  ;;  %v624_v27 = vld [vmem:[#allocation9 + $0x400] sm:$0xff] }
 0x13f   :  { %1083 = vmatpush2.msra.mxu1 %v744_v28  ;;  %1154 = vmatpush2.msra.mxu0 %v1000_v29  ;;  %v880_v28 = vld [vmem:[#allocation9 + $0xc00] sm:$0xff]  ;;  %v619_v29 = vld [vmem:[#allocation9 + $0x3d8] sm:$0xff] }
 0x140   :  { %1084 = vmatprep.subr.mxu1 %v737_v30  ;;  %1155 = vmatprep.subr.mxu0 %v993_v31  ;;  %v875_v30 = vld [vmem:[#allocation9 + $0xbd8] sm:$0xff]  ;;  %v340_v31 = vsub.s32 2, %v1874_v13 }
 0x141   :  { %1085 = vmatpush2.msra.mxu1 %v736_v32  ;;  %1156 = vmatpush2.msra.mxu0 %v992_v33  ;;  %v328_v32 = vld [vmem:[#allocation7] sm:$0xf]  ;;  %v344_v33 = vsub.s32 3, %v1874_v13 }
 0x142   :  { %1086 = vmatprep.subr.mxu1 %v729_v34  ;;  %1157 = vmatprep.subr.mxu0 %v985_v35  ;;  %v333_v34 = vrot.slane %v328_v32, %v1877_v14  ;;  %v341_v35 = vrot.slane %v328_v32, %v340_v31 }
 0x143   :  { %1087 = vmatpush2.msra.mxu1 %v728_v36  ;;  %1158 = vmatpush2.msra.mxu0 %v984_v37  ;;  %v337_v36 = vrot.slane %v328_v32, %v1880_v16  ;;  %v345_v37 = vrot.slane %v328_v32, %v344_v33  ;;  %v531_v32 = vld [vmem:[#allocation9 + $0x118] sm:$0xff] }
 0x144   :  { %1088 = vmatprep.subr.mxu1 %v721_v38  ;;  %1159 = vmatprep.subr.mxu0 %v977_v39 }
 0x145   :  { %1089 = vmatpush2.msra.mxu1 %v720_v40  ;;  %1160 = vmatpush2.msra.mxu0 %v976_v41 }
 0x146   :  { %1090 = vmatprep.subr.mxu1 %v713_v42  ;;  %1161 = vmatprep.subr.mxu0 %v969_v43 }
 0x147   :  { %1091 = vmatpush2.msra.mxu1 %v712_v44  ;;  %1162 = vmatpush2.msra.mxu0 %v968_v45 }
 0x148   :  { %1092 = vmatprep.subr.mxu1 %v705_v46  ;;  %1163 = vmatprep.subr.mxu0 %v961_v47 }
 0x149   :  { %1093 = vmatpush2.msra.mxu1 %v704_v48  ;;  %1164 = vmatpush2.msra.mxu0 %v960_v49 }
 0x14a   :  { %1094 = vmatprep.subr.mxu1 %v697_v50  ;;  %1165 = vmatprep.subr.mxu0 %v953_v51  ;;  %v618_v50 = vld [vmem:[#allocation9 + $0x3d0] sm:$0xff] }
 0x14b   :  { %1095 = vmatpush2.msra.mxu1 %v696_v52  ;;  %1166 = vmatpush2.msra.mxu0 %v952_v53  ;;  %v874_v51 = vld [vmem:[#allocation9 + $0xbd0] sm:$0xff]  ;;  %v611_v52 = vld [vmem:[#allocation9 + $0x398] sm:$0xff] }
 0x14c   :  { %1096 = vmatprep.subr.mxu1 %v689_v54  ;;  %1167 = vmatprep.subr.mxu0 %v945_v55  ;;  %v867_v53 = vld [vmem:[#allocation9 + $0xb98] sm:$0xff]  ;;  %v610_v54 = vld [vmem:[#allocation9 + $0x390] sm:$0xff] }
 0x14d   :  { %1097 = vmatpush2.msra.mxu1 %v688_v56  ;;  %1168 = vmatpush2.msra.mxu0 %v944_v57  ;;  %v866_v55 = vld [vmem:[#allocation9 + $0xb90] sm:$0xff]  ;;  %v603_v56 = vld [vmem:[#allocation9 + $0x358] sm:$0xff] }
 0x14e   :  { %1098 = vmatprep.subr.mxu1 %v681_v58  ;;  %1169 = vmatprep.subr.mxu0 %v937_v59  ;;  %v859_v57 = vld [vmem:[#allocation9 + $0xb58] sm:$0xff]  ;;  %v602_v58 = vld [vmem:[#allocation9 + $0x350] sm:$0xff] }
 0x14f   :  { %1099 = vmatpush2.msra.mxu1 %v680_v60  ;;  %1170 = vmatpush2.msra.mxu0 %v936_v61  ;;  %v858_v59 = vld [vmem:[#allocation9 + $0xb50] sm:$0xff]  ;;  %v595_v60 = vld [vmem:[#allocation9 + $0x318] sm:$0xff] }
 0x150   :  { %1100 = vmatprep.subr.mxu1 %v673_v62  ;;  %1171 = vmatprep.subr.mxu0 %v929_v63  ;;  %v851_v61 = vld [vmem:[#allocation9 + $0xb18] sm:$0xff]  ;;  %v594_v62 = vld [vmem:[#allocation9 + $0x310] sm:$0xff] }
 0x151   :  { %1101 = vmatpush2.msra.mxu1 %v672_v0  ;;  %1172 = vmatpush2.msra.mxu0 %v928_v1  ;;  %v850_v63 = vld [vmem:[#allocation9 + $0xb10] sm:$0xff]  ;;  %v587_v0 = vld [vmem:[#allocation9 + $0x2d8] sm:$0xff] }
 0x152   :  { %1102 = vmatprep.subr.mxu1 %v665_v2  ;;  %1173 = vmatprep.subr.mxu0 %v921_v3  ;;  %v843_v1 = vld [vmem:[#allocation9 + $0xad8] sm:$0xff]  ;;  %v586_v2 = vld [vmem:[#allocation9 + $0x2d0] sm:$0xff] }
 0x153   :  { %1103 = vmatpush2.msra.mxu1 %v664_v4  ;;  %1174 = vmatpush2.msra.mxu0 %v920_v5  ;;  %v842_v3 = vld [vmem:[#allocation9 + $0xad0] sm:$0xff]  ;;  %v579_v4 = vld [vmem:[#allocation9 + $0x298] sm:$0xff] }
 0x154   :  { %1104 = vmatprep.subr.mxu1 %v657_v6  ;;  %1175 = vmatprep.subr.mxu0 %v913_v7  ;;  %v835_v5 = vld [vmem:[#allocation9 + $0xa98] sm:$0xff]  ;;  %v578_v6 = vld [vmem:[#allocation9 + $0x290] sm:$0xff] }
 0x155   :  { %1105 = vmatpush2.msra.mxu1 %v656_v8  ;;  %1176 = vmatpush2.msra.mxu0 %v912_v9  ;;  %v834_v7 = vld [vmem:[#allocation9 + $0xa90] sm:$0xff]  ;;  %v571_v8 = vld [vmem:[#allocation9 + $0x258] sm:$0xff] }
 0x156   :  { %1106 = vmatprep.subr.mxu1 %v649_v10  ;;  %1177 = vmatprep.subr.mxu0 %v905_v11  ;;  %v827_v9 = vld [vmem:[#allocation9 + $0xa58] sm:$0xff]  ;;  %v570_v10 = vld [vmem:[#allocation9 + $0x250] sm:$0xff] }
 0x157   :  { %1107 = vmatpush2.msra.mxu1 %v648_v12  ;;  %1178 = vmatpush2.msra.mxu0 %v904_v15  ;;  %v826_v11 = vld [vmem:[#allocation9 + $0xa50] sm:$0xff]  ;;  %v563_v12 = vld [vmem:[#allocation9 + $0x218] sm:$0xff] }
 0x158   :  { %1108 = vmatprep.subr.mxu1 %v641_v17  ;;  %1179 = vmatprep.subr.mxu0 %v897_v18  ;;  %v819_v15 = vld [vmem:[#allocation9 + $0xa18] sm:$0xff]  ;;  %v562_v17 = vld [vmem:[#allocation9 + $0x210] sm:$0xff] }
 0x159   :  { %1109 = vmatpush2.msra.mxu1 %v640_v19  ;;  %1180 = vmatpush2.msra.mxu0 %v896_v20  ;;  %v818_v18 = vld [vmem:[#allocation9 + $0xa10] sm:$0xff]  ;;  %v555_v19 = vld [vmem:[#allocation9 + $0x1d8] sm:$0xff] }
 0x15a   :  { %1110 = vmatprep.subr.mxu1 %v633_v21  ;;  %1181 = vmatprep.subr.mxu0 %v889_v22  ;;  %v811_v20 = vld [vmem:[#allocation9 + $0x9d8] sm:$0xff]  ;;  %v554_v21 = vld [vmem:[#allocation9 + $0x1d0] sm:$0xff] }
 0x15b   :  { %1111 = vmatpush2.msra.mxu1 %v632_v23  ;;  %1182 = vmatpush2.msra.mxu0 %v888_v24  ;;  %v810_v22 = vld [vmem:[#allocation9 + $0x9d0] sm:$0xff]  ;;  %v547_v23 = vld [vmem:[#allocation9 + $0x198] sm:$0xff] }
 0x15c   :  { %1112 = vmatprep.subr.mxu1 %v625_v25  ;;  %1183 = vmatprep.subr.mxu0 %v881_v26  ;;  %v803_v24 = vld [vmem:[#allocation9 + $0x998] sm:$0xff]  ;;  %v546_v25 = vld [vmem:[#allocation9 + $0x190] sm:$0xff] }
 0x15d   :  { %1113 = vmatpush2.msra.mxu1 %v624_v27  ;;  %1184 = vmatpush2.msra.mxu0 %v880_v28  ;;  %v802_v26 = vld [vmem:[#allocation9 + $0x990] sm:$0xff]  ;;  %v539_v27 = vld [vmem:[#allocation9 + $0x158] sm:$0xff] }
 0x15e   :  { %1192 = vmatprep.subr.mxu1 %v619_v29  ;;  %1263 = vmatprep.subr.mxu0 %v875_v30  ;;  %v795_v28 = vld [vmem:[#allocation9 + $0x958] sm:$0xff]  ;;  %v538_v29 = vld [vmem:[#allocation9 + $0x150] sm:$0xff] }
 0x15f   :  { %v794_v30 = vld [vmem:[#allocation9 + $0x950] sm:$0xff] }
 0x1de   :  { %v416_v38 = vpop.f32.mrf.mxu1  ;;  %v487_v39 = vpop.f32.mrf.mxu0 }
 0x1df   :  { %v417_v40 = vadd.f32 %v416_v38, %v333_v34  ;;  %v488_v41 = vadd.f32 %v487_v39, %v341_v35  ;;  %v787_v34 = vld [vmem:[#allocation9 + $0x918] sm:$0xff]  ;;  %v530_v35 = vld [vmem:[#allocation9 + $0x110] sm:$0xff] }
 0x1e0   :  { %v418_v42 = vpop.f32.mrf.mxu1  ;;  %v489_v43 = vpop.f32.mrf.mxu0  ;;  %v779_v38 = vld [vmem:[#allocation9 + $0x8d8] sm:$0xff]  ;;  %v522_v39 = vld [vmem:[#allocation9 + $0xd0] sm:$0xff] }
 0x1e1   :  { %v419_v44 = vadd.f32 %v418_v42, %v337_v36  ;;  %v490_v45 = vadd.f32 %v489_v43, %v345_v37  ;;  %v1896_v48 = vmax.f32 %v417_v40, 0.0  ;;  %v1898_v49 = vmax.f32 %v488_v41, 0.0  ;;  %v786_v36 = vld [vmem:[#allocation9 + $0x910] sm:$0xff]  ;;  %v523_v37 = vld [vmem:[#allocation9 + $0xd8] sm:$0xff] }
 0x1e2   :  { %v778_v40 = vld [vmem:[#allocation9 + $0x8d0] sm:$0xff]  ;;  %v515_v41 = vld [vmem:[#allocation9 + $0x98] sm:$0xff] }
 0x1e3   :  { %v1892_v46 = vmax.f32 %v419_v44, 0.0  ;;  %v1894_v47 = vmax.f32 %v490_v45, 0.0  ;;  %v771_v42 = vld [vmem:[#allocation9 + $0x898] sm:$0xff]  ;;  %v514_v43 = vld [vmem:[#allocation9 + $0x90] sm:$0xff] }
 0x1e4   :  { %v770_v44 = vld [vmem:[#allocation9 + $0x890] sm:$0xff]  ;;  %v507_v45 = vld [vmem:[#allocation9 + $0x58] sm:$0xff] }
 0x1e5   :  { %1114 = vmatprep.mubr.f32.mxu1 %v1892_v46  ;;  %1185 = vmatprep.mubr.f32.mxu0 %v1894_v47 }
 0x1e6   :  { %1115 = vmatmul.mubr.f32.vlgmr.msra.gmra.mxu1 %v1896_v48  ;;  %1186 = vmatmul.mubr.f32.vlgmr.msra.gmra.mxu0 %v1898_v49 }
 0x1e7   :  { %1193 = vmatpush1.msra.mxu1 %v618_v50  ;;  %1264 = vmatpush1.msra.mxu0 %v874_v51  ;;  %v763_v50 = vld [vmem:[#allocation9 + $0x858] sm:$0xff]  ;;  %v506_v51 = vld [vmem:[#allocation9 + $0x50] sm:$0xff] }
 0x1e8   :  { %1194 = vmatprep.subr.mxu1 %v611_v52  ;;  %1256 = vmatprep.mubr.f32.mxu1 %v1892_v46  ;;  %v762_v52 = vld [vmem:[#allocation9 + $0x850] sm:$0xff] }
 0x1e9   :  { %1265 = vmatprep.subr.mxu0 %v867_v53  ;;  %1327 = vmatprep.mubr.f32.mxu0 %v1894_v47  ;;  %v499_v53 = vld [vmem:[#allocation9 + $0x18] sm:$0xff] }
 0x1ea   :  { %1195 = vmatpush1.msra.mxu1 %v610_v54  ;;  %1266 = vmatpush1.msra.mxu0 %v866_v55  ;;  %v755_v54 = vld [vmem:[#allocation9 + $0x818] sm:$0xff]  ;;  %v498_v55 = vld [vmem:[#allocation9 + $0x10] sm:$0xff] }
 0x1eb   :  { %1196 = vmatprep.subr.mxu1 %v603_v56  ;;  %1267 = vmatprep.subr.mxu0 %v859_v57  ;;  %v754_v56 = vld [vmem:[#allocation9 + $0x810] sm:$0xff]  ;;  %v747_v57 = vld [vmem:[#allocation9 + $0x7d8] sm:$0xff] }
 0x1ec   :  { %1197 = vmatpush1.msra.mxu1 %v602_v58  ;;  %1268 = vmatpush1.msra.mxu0 %v858_v59  ;;  %v1003_v58 = vld [vmem:[#allocation9 + $0xfd8] sm:$0xff]  ;;  %v746_v59 = vld [vmem:[#allocation9 + $0x7d0] sm:$0xff] }
 0x1ed   :  { %1198 = vmatprep.subr.mxu1 %v595_v60  ;;  %1269 = vmatprep.subr.mxu0 %v851_v61  ;;  %v1002_v60 = vld [vmem:[#allocation9 + $0xfd0] sm:$0xff]  ;;  %v739_v61 = vld [vmem:[#allocation9 + $0x798] sm:$0xff] }
 0x1ee   :  { %1199 = vmatpush1.msra.mxu1 %v594_v62  ;;  %1270 = vmatpush1.msra.mxu0 %v850_v63  ;;  %v995_v62 = vld [vmem:[#allocation9 + $0xf98] sm:$0xff]  ;;  %v738_v63 = vld [vmem:[#allocation9 + $0x790] sm:$0xff] }
 0x1ef   :  { %1200 = vmatprep.subr.mxu1 %v587_v0  ;;  %1271 = vmatprep.subr.mxu0 %v843_v1  ;;  %v994_v0 = vld [vmem:[#allocation9 + $0xf90] sm:$0xff]  ;;  %v731_v1 = vld [vmem:[#allocation9 + $0x758] sm:$0xff] }
 0x1f0   :  { %1201 = vmatpush1.msra.mxu1 %v586_v2  ;;  %1272 = vmatpush1.msra.mxu0 %v842_v3  ;;  %v987_v2 = vld [vmem:[#allocation9 + $0xf58] sm:$0xff]  ;;  %v730_v3 = vld [vmem:[#allocation9 + $0x750] sm:$0xff] }
 0x1f1   :  { %1202 = vmatprep.subr.mxu1 %v579_v4  ;;  %1273 = vmatprep.subr.mxu0 %v835_v5  ;;  %v986_v4 = vld [vmem:[#allocation9 + $0xf50] sm:$0xff]  ;;  %v723_v5 = vld [vmem:[#allocation9 + $0x718] sm:$0xff] }
 0x1f2   :  { %1203 = vmatpush1.msra.mxu1 %v578_v6  ;;  %1274 = vmatpush1.msra.mxu0 %v834_v7  ;;  %v979_v6 = vld [vmem:[#allocation9 + $0xf18] sm:$0xff]  ;;  %v722_v7 = vld [vmem:[#allocation9 + $0x710] sm:$0xff] }
 0x1f3   :  { %1204 = vmatprep.subr.mxu1 %v571_v8  ;;  %1275 = vmatprep.subr.mxu0 %v827_v9  ;;  %v978_v8 = vld [vmem:[#allocation9 + $0xf10] sm:$0xff]  ;;  %v715_v9 = vld [vmem:[#allocation9 + $0x6d8] sm:$0xff] }
 0x1f4   :  { %1205 = vmatpush1.msra.mxu1 %v570_v10  ;;  %1276 = vmatpush1.msra.mxu0 %v826_v11  ;;  %v971_v10 = vld [vmem:[#allocation9 + $0xed8] sm:$0xff]  ;;  %v714_v11 = vld [vmem:[#allocation9 + $0x6d0] sm:$0xff] }
 0x1f5   :  { %1206 = vmatprep.subr.mxu1 %v563_v12  ;;  %1277 = vmatprep.subr.mxu0 %v819_v15  ;;  %v970_v12 = vld [vmem:[#allocation9 + $0xed0] sm:$0xff]  ;;  %v707_v15 = vld [vmem:[#allocation9 + $0x698] sm:$0xff] }
 0x1f6   :  { %1207 = vmatpush1.msra.mxu1 %v562_v17  ;;  %1278 = vmatpush1.msra.mxu0 %v818_v18  ;;  %v963_v17 = vld [vmem:[#allocation9 + $0xe98] sm:$0xff]  ;;  %v706_v18 = vld [vmem:[#allocation9 + $0x690] sm:$0xff] }
 0x1f7   :  { %1208 = vmatprep.subr.mxu1 %v555_v19  ;;  %1279 = vmatprep.subr.mxu0 %v811_v20  ;;  %v962_v19 = vld [vmem:[#allocation9 + $0xe90] sm:$0xff]  ;;  %v699_v20 = vld [vmem:[#allocation9 + $0x658] sm:$0xff] }
 0x1f8   :  { %1209 = vmatpush1.msra.mxu1 %v554_v21  ;;  %1280 = vmatpush1.msra.mxu0 %v810_v22  ;;  %v955_v21 = vld [vmem:[#allocation9 + $0xe58] sm:$0xff]  ;;  %v698_v22 = vld [vmem:[#allocation9 + $0x650] sm:$0xff] }
 0x1f9   :  { %1210 = vmatprep.subr.mxu1 %v547_v23  ;;  %1281 = vmatprep.subr.mxu0 %v803_v24  ;;  %v954_v23 = vld [vmem:[#allocation9 + $0xe50] sm:$0xff]  ;;  %v691_v24 = vld [vmem:[#allocation9 + $0x618] sm:$0xff] }
 0x1fa   :  { %1211 = vmatpush1.msra.mxu1 %v546_v25  ;;  %1282 = vmatpush1.msra.mxu0 %v802_v26  ;;  %v947_v25 = vld [vmem:[#allocation9 + $0xe18] sm:$0xff]  ;;  %v690_v26 = vld [vmem:[#allocation9 + $0x610] sm:$0xff] }
 0x1fb   :  { %1212 = vmatprep.subr.mxu1 %v539_v27  ;;  %1283 = vmatprep.subr.mxu0 %v795_v28  ;;  %v946_v27 = vld [vmem:[#allocation9 + $0xe10] sm:$0xff]  ;;  %v683_v28 = vld [vmem:[#allocation9 + $0x5d8] sm:$0xff] }
 0x1fc   :  { %1213 = vmatpush1.msra.mxu1 %v538_v29  ;;  %1284 = vmatpush1.msra.mxu0 %v794_v30  ;;  %v939_v29 = vld [vmem:[#allocation9 + $0xdd8] sm:$0xff]  ;;  %v682_v30 = vld [vmem:[#allocation9 + $0x5d0] sm:$0xff] }
 0x1fd   :  { %1214 = vmatprep.subr.mxu1 %v531_v32  ;;  %1285 = vmatprep.subr.mxu0 %v787_v34  ;;  %v938_v32 = vld [vmem:[#allocation9 + $0xdd0] sm:$0xff]  ;;  %v675_v34 = vld [vmem:[#allocation9 + $0x598] sm:$0xff] }
 0x1fe   :  { %1215 = vmatpush1.msra.mxu1 %v530_v35  ;;  %1286 = vmatpush1.msra.mxu0 %v786_v36  ;;  %v931_v35 = vld [vmem:[#allocation9 + $0xd98] sm:$0xff]  ;;  %v674_v36 = vld [vmem:[#allocation9 + $0x590] sm:$0xff] }
 0x1ff   :  { %1216 = vmatprep.subr.mxu1 %v523_v37  ;;  %1287 = vmatprep.subr.mxu0 %v779_v38  ;;  %v930_v37 = vld [vmem:[#allocation9 + $0xd90] sm:$0xff]  ;;  %v667_v38 = vld [vmem:[#allocation9 + $0x558] sm:$0xff] }
 0x200   :  { %1217 = vmatpush1.msra.mxu1 %v522_v39  ;;  %1288 = vmatpush1.msra.mxu0 %v778_v40  ;;  %v923_v39 = vld [vmem:[#allocation9 + $0xd58] sm:$0xff]  ;;  %v666_v40 = vld [vmem:[#allocation9 + $0x550] sm:$0xff] }
 0x201   :  { %1218 = vmatprep.subr.mxu1 %v515_v41  ;;  %1289 = vmatprep.subr.mxu0 %v771_v42  ;;  %v922_v41 = vld [vmem:[#allocation9 + $0xd50] sm:$0xff]  ;;  %v659_v42 = vld [vmem:[#allocation9 + $0x518] sm:$0xff] }
 0x202   :  { %1219 = vmatpush1.msra.mxu1 %v514_v43  ;;  %1290 = vmatpush1.msra.mxu0 %v770_v44  ;;  %v915_v43 = vld [vmem:[#allocation9 + $0xd18] sm:$0xff]  ;;  %v658_v44 = vld [vmem:[#allocation9 + $0x510] sm:$0xff] }
 0x203   :  { %1220 = vmatprep.subr.mxu1 %v507_v45  ;;  %1291 = vmatprep.subr.mxu0 %v763_v50  ;;  %v914_v45 = vld [vmem:[#allocation9 + $0xd10] sm:$0xff]  ;;  %v651_v50 = vld [vmem:[#allocation9 + $0x4d8] sm:$0xff] }
 0x204   :  { %1221 = vmatpush1.msra.mxu1 %v506_v51  ;;  %1292 = vmatpush1.msra.mxu0 %v762_v52  ;;  %v907_v51 = vld [vmem:[#allocation9 + $0xcd8] sm:$0xff]  ;;  %v650_v52 = vld [vmem:[#allocation9 + $0x4d0] sm:$0xff] }
 0x205   :  { %1222 = vmatprep.subr.mxu1 %v499_v53  ;;  %1293 = vmatprep.subr.mxu0 %v755_v54  ;;  %v906_v53 = vld [vmem:[#allocation9 + $0xcd0] sm:$0xff]  ;;  %v643_v54 = vld [vmem:[#allocation9 + $0x498] sm:$0xff] }
 0x206   :  { %1223 = vmatpush1.msra.mxu1 %v498_v55  ;;  %1294 = vmatpush1.msra.mxu0 %v754_v56  ;;  %v899_v55 = vld [vmem:[#allocation9 + $0xc98] sm:$0xff]  ;;  %v642_v56 = vld [vmem:[#allocation9 + $0x490] sm:$0xff] }
 0x207   :  { %1224 = vmatprep.subr.mxu1 %v747_v57  ;;  %1295 = vmatprep.subr.mxu0 %v1003_v58  ;;  %v898_v57 = vld [vmem:[#allocation9 + $0xc90] sm:$0xff]  ;;  %v635_v58 = vld [vmem:[#allocation9 + $0x458] sm:$0xff] }
 0x208   :  { %1225 = vmatpush2.msra.mxu1 %v746_v59  ;;  %1296 = vmatpush2.msra.mxu0 %v1002_v60  ;;  %v891_v59 = vld [vmem:[#allocation9 + $0xc58] sm:$0xff]  ;;  %v634_v60 = vld [vmem:[#allocation9 + $0x450] sm:$0xff] }
 0x209   :  { %1226 = vmatprep.subr.mxu1 %v739_v61  ;;  %1297 = vmatprep.subr.mxu0 %v995_v62  ;;  %v890_v61 = vld [vmem:[#allocation9 + $0xc50] sm:$0xff]  ;;  %v627_v62 = vld [vmem:[#allocation9 + $0x418] sm:$0xff] }
 0x20a   :  { %1227 = vmatpush2.msra.mxu1 %v738_v63  ;;  %1298 = vmatpush2.msra.mxu0 %v994_v0  ;;  %v883_v63 = vld [vmem:[#allocation9 + $0xc18] sm:$0xff]  ;;  %v626_v0 = vld [vmem:[#allocation9 + $0x410] sm:$0xff] }
 0x20b   :  { %1228 = vmatprep.subr.mxu1 %v731_v1  ;;  %1299 = vmatprep.subr.mxu0 %v987_v2  ;;  %v882_v1 = vld [vmem:[#allocation9 + $0xc10] sm:$0xff]  ;;  %v621_v2 = vld [vmem:[#allocation9 + $0x3e8] sm:$0xff] }
 0x20c   :  { %1229 = vmatpush2.msra.mxu1 %v730_v3  ;;  %1300 = vmatpush2.msra.mxu0 %v986_v4  ;;  %v877_v3 = vld [vmem:[#allocation9 + $0xbe8] sm:$0xff]  ;;  %v620_v4 = vld [vmem:[#allocation9 + $0x3e0] sm:$0xff] }
 0x20d   :  { %1230 = vmatprep.subr.mxu1 %v723_v5  ;;  %1301 = vmatprep.subr.mxu0 %v979_v6  ;;  %v876_v5 = vld [vmem:[#allocation9 + $0xbe0] sm:$0xff]  ;;  %v613_v6 = vld [vmem:[#allocation9 + $0x3a8] sm:$0xff] }
 0x20e   :  { %1231 = vmatpush2.msra.mxu1 %v722_v7  ;;  %1302 = vmatpush2.msra.mxu0 %v978_v8  ;;  %v869_v7 = vld [vmem:[#allocation9 + $0xba8] sm:$0xff]  ;;  %v612_v8 = vld [vmem:[#allocation9 + $0x3a0] sm:$0xff] }
 0x20f   :  { %1232 = vmatprep.subr.mxu1 %v715_v9  ;;  %1303 = vmatprep.subr.mxu0 %v971_v10  ;;  %v868_v9 = vld [vmem:[#allocation9 + $0xba0] sm:$0xff]  ;;  %v605_v10 = vld [vmem:[#allocation9 + $0x368] sm:$0xff] }
 0x210   :  { %1233 = vmatpush2.msra.mxu1 %v714_v11  ;;  %1304 = vmatpush2.msra.mxu0 %v970_v12  ;;  %v861_v11 = vld [vmem:[#allocation9 + $0xb68] sm:$0xff]  ;;  %v604_v12 = vld [vmem:[#allocation9 + $0x360] sm:$0xff] }
 0x211   :  { %1234 = vmatprep.subr.mxu1 %v707_v15  ;;  %1305 = vmatprep.subr.mxu0 %v963_v17  ;;  %v860_v15 = vld [vmem:[#allocation9 + $0xb60] sm:$0xff]  ;;  %v597_v17 = vld [vmem:[#allocation9 + $0x328] sm:$0xff] }
 0x212   :  { %1235 = vmatpush2.msra.mxu1 %v706_v18  ;;  %1306 = vmatpush2.msra.mxu0 %v962_v19  ;;  %v853_v18 = vld [vmem:[#allocation9 + $0xb28] sm:$0xff]  ;;  %v596_v19 = vld [vmem:[#allocation9 + $0x320] sm:$0xff] }
 0x213   :  { %1236 = vmatprep.subr.mxu1 %v699_v20  ;;  %1307 = vmatprep.subr.mxu0 %v955_v21  ;;  %v852_v20 = vld [vmem:[#allocation9 + $0xb20] sm:$0xff]  ;;  %v589_v21 = vld [vmem:[#allocation9 + $0x2e8] sm:$0xff] }
 0x214   :  { %1237 = vmatpush2.msra.mxu1 %v698_v22  ;;  %1308 = vmatpush2.msra.mxu0 %v954_v23  ;;  %v845_v22 = vld [vmem:[#allocation9 + $0xae8] sm:$0xff]  ;;  %v588_v23 = vld [vmem:[#allocation9 + $0x2e0] sm:$0xff] }
 0x215   :  { %1238 = vmatprep.subr.mxu1 %v691_v24  ;;  %1309 = vmatprep.subr.mxu0 %v947_v25  ;;  %v844_v24 = vld [vmem:[#allocation9 + $0xae0] sm:$0xff]  ;;  %v581_v25 = vld [vmem:[#allocation9 + $0x2a8] sm:$0xff] }
 0x216   :  { %1239 = vmatpush2.msra.mxu1 %v690_v26  ;;  %1310 = vmatpush2.msra.mxu0 %v946_v27  ;;  %v837_v26 = vld [vmem:[#allocation9 + $0xaa8] sm:$0xff]  ;;  %v580_v27 = vld [vmem:[#allocation9 + $0x2a0] sm:$0xff] }
 0x217   :  { %1240 = vmatprep.subr.mxu1 %v683_v28  ;;  %1311 = vmatprep.subr.mxu0 %v939_v29  ;;  %v836_v28 = vld [vmem:[#allocation9 + $0xaa0] sm:$0xff]  ;;  %v573_v29 = vld [vmem:[#allocation9 + $0x268] sm:$0xff] }
 0x218   :  { %1241 = vmatpush2.msra.mxu1 %v682_v30  ;;  %1312 = vmatpush2.msra.mxu0 %v938_v32  ;;  %v829_v30 = vld [vmem:[#allocation9 + $0xa68] sm:$0xff]  ;;  %v572_v32 = vld [vmem:[#allocation9 + $0x260] sm:$0xff] }
 0x219   :  { %1242 = vmatprep.subr.mxu1 %v675_v34  ;;  %1313 = vmatprep.subr.mxu0 %v931_v35  ;;  %v828_v34 = vld [vmem:[#allocation9 + $0xa60] sm:$0xff]  ;;  %v565_v35 = vld [vmem:[#allocation9 + $0x228] sm:$0xff] }
 0x21a   :  { %1243 = vmatpush2.msra.mxu1 %v674_v36  ;;  %1314 = vmatpush2.msra.mxu0 %v930_v37  ;;  %v821_v36 = vld [vmem:[#allocation9 + $0xa28] sm:$0xff]  ;;  %v564_v37 = vld [vmem:[#allocation9 + $0x220] sm:$0xff] }
 0x21b   :  { %1244 = vmatprep.subr.mxu1 %v667_v38  ;;  %1315 = vmatprep.subr.mxu0 %v923_v39  ;;  %v820_v38 = vld [vmem:[#allocation9 + $0xa20] sm:$0xff]  ;;  %v557_v39 = vld [vmem:[#allocation9 + $0x1e8] sm:$0xff] }
 0x21c   :  { %1245 = vmatpush2.msra.mxu1 %v666_v40  ;;  %1316 = vmatpush2.msra.mxu0 %v922_v41  ;;  %v813_v40 = vld [vmem:[#allocation9 + $0x9e8] sm:$0xff]  ;;  %v556_v41 = vld [vmem:[#allocation9 + $0x1e0] sm:$0xff] }
 0x21d   :  { %1246 = vmatprep.subr.mxu1 %v659_v42  ;;  %1317 = vmatprep.subr.mxu0 %v915_v43  ;;  %v812_v42 = vld [vmem:[#allocation9 + $0x9e0] sm:$0xff]  ;;  %v549_v43 = vld [vmem:[#allocation9 + $0x1a8] sm:$0xff] }
 0x21e   :  { %1247 = vmatpush2.msra.mxu1 %v658_v44  ;;  %1318 = vmatpush2.msra.mxu0 %v914_v45  ;;  %v805_v44 = vld [vmem:[#allocation9 + $0x9a8] sm:$0xff]  ;;  %v548_v45 = vld [vmem:[#allocation9 + $0x1a0] sm:$0xff] }
 0x21f   :  { %1248 = vmatprep.subr.mxu1 %v651_v50  ;;  %1319 = vmatprep.subr.mxu0 %v907_v51  ;;  %v804_v50 = vld [vmem:[#allocation9 + $0x9a0] sm:$0xff]  ;;  %v541_v51 = vld [vmem:[#allocation9 + $0x168] sm:$0xff] }
 0x220   :  { %1249 = vmatpush2.msra.mxu1 %v650_v52  ;;  %1320 = vmatpush2.msra.mxu0 %v906_v53  ;;  %v797_v52 = vld [vmem:[#allocation9 + $0x968] sm:$0xff]  ;;  %v540_v53 = vld [vmem:[#allocation9 + $0x160] sm:$0xff] }
 0x221   :  { %1250 = vmatprep.subr.mxu1 %v643_v54  ;;  %1321 = vmatprep.subr.mxu0 %v899_v55  ;;  %v796_v54 = vld [vmem:[#allocation9 + $0x960] sm:$0xff]  ;;  %v533_v55 = vld [vmem:[#allocation9 + $0x128] sm:$0xff] }
 0x222   :  { %1251 = vmatpush2.msra.mxu1 %v642_v56  ;;  %1322 = vmatpush2.msra.mxu0 %v898_v57  ;;  %v789_v56 = vld [vmem:[#allocation9 + $0x928] sm:$0xff]  ;;  %v532_v57 = vld [vmem:[#allocation9 + $0x120] sm:$0xff] }
 0x223   :  { %1252 = vmatprep.subr.mxu1 %v635_v58  ;;  %1323 = vmatprep.subr.mxu0 %v891_v59  ;;  %v788_v58 = vld [vmem:[#allocation9 + $0x920] sm:$0xff]  ;;  %v525_v59 = vld [vmem:[#allocation9 + $0xe8] sm:$0xff] }
 0x224   :  { %1253 = vmatpush2.msra.mxu1 %v634_v60  ;;  %1324 = vmatpush2.msra.mxu0 %v890_v61  ;;  %v781_v60 = vld [vmem:[#allocation9 + $0x8e8] sm:$0xff]  ;;  %v524_v61 = vld [vmem:[#allocation9 + $0xe0] sm:$0xff] }
 0x225   :  { %1254 = vmatprep.subr.mxu1 %v627_v62  ;;  %1325 = vmatprep.subr.mxu0 %v883_v63  ;;  %v780_v62 = vld [vmem:[#allocation9 + $0x8e0] sm:$0xff]  ;;  %v517_v63 = vld [vmem:[#allocation9 + $0xa8] sm:$0xff] }
 0x226   :  { %1255 = vmatpush2.msra.mxu1 %v626_v0  ;;  %1326 = vmatpush2.msra.mxu0 %v882_v1  ;;  %v773_v0 = vld [vmem:[#allocation9 + $0x8a8] sm:$0xff]  ;;  %v516_v1 = vld [vmem:[#allocation9 + $0xa0] sm:$0xff] }
 0x227   :  { %1257 = vmatmul.mubr.f32.vlgmr.msra.gmra.mxu1 %v1896_v48  ;;  %1328 = vmatmul.mubr.f32.vlgmr.msra.gmra.mxu0 %v1898_v49 }
 0x228   :  { %1334 = vmatprep.subr.mxu1 %v621_v2  ;;  %1405 = vmatprep.subr.mxu0 %v877_v3  ;;  %v772_v2 = vld [vmem:[#allocation9 + $0x8a0] sm:$0xff]  ;;  %v509_v3 = vld [vmem:[#allocation9 + $0x68] sm:$0xff] }
 0x229   :  { %1335 = vmatpush1.msra.mxu1 %v620_v4  ;;  %1398 = vmatprep.mubr.f32.mxu1 %v1892_v46  ;;  %v765_v4 = vld [vmem:[#allocation9 + $0x868] sm:$0xff] }
 0x22a   :  { %1406 = vmatpush1.msra.mxu0 %v876_v5  ;;  %1469 = vmatprep.mubr.f32.mxu0 %v1894_v47  ;;  %v508_v5 = vld [vmem:[#allocation9 + $0x60] sm:$0xff] }
 0x22b   :  { %1336 = vmatprep.subr.mxu1 %v613_v6  ;;  %1407 = vmatprep.subr.mxu0 %v869_v7  ;;  %v764_v6 = vld [vmem:[#allocation9 + $0x860] sm:$0xff]  ;;  %v501_v7 = vld [vmem:[#allocation9 + $0x28] sm:$0xff] }
 0x22c   :  { %1337 = vmatpush1.msra.mxu1 %v612_v8  ;;  %1408 = vmatpush1.msra.mxu0 %v868_v9  ;;  %v757_v8 = vld [vmem:[#allocation9 + $0x828] sm:$0xff]  ;;  %v500_v9 = vld [vmem:[#allocation9 + $0x20] sm:$0xff] }
 0x22d   :  { %1338 = vmatprep.subr.mxu1 %v605_v10  ;;  %1409 = vmatprep.subr.mxu0 %v861_v11  ;;  %v756_v10 = vld [vmem:[#allocation9 + $0x820] sm:$0xff]  ;;  %v749_v11 = vld [vmem:[#allocation9 + $0x7e8] sm:$0xff] }
 0x22e   :  { %1339 = vmatpush1.msra.mxu1 %v604_v12  ;;  %1410 = vmatpush1.msra.mxu0 %v860_v15  ;;  %v1005_v12 = vld [vmem:[#allocation9 + $0xfe8] sm:$0xff]  ;;  %v748_v15 = vld [vmem:[#allocation9 + $0x7e0] sm:$0xff] }
 0x22f   :  { %1340 = vmatprep.subr.mxu1 %v597_v17  ;;  %1411 = vmatprep.subr.mxu0 %v853_v18  ;;  %v1004_v17 = vld [vmem:[#allocation9 + $0xfe0] sm:$0xff]  ;;  %v741_v18 = vld [vmem:[#allocation9 + $0x7a8] sm:$0xff] }
 0x230   :  { %1341 = vmatpush1.msra.mxu1 %v596_v19  ;;  %1412 = vmatpush1.msra.mxu0 %v852_v20  ;;  %v997_v19 = vld [vmem:[#allocation9 + $0xfa8] sm:$0xff]  ;;  %v740_v20 = vld [vmem:[#allocation9 + $0x7a0] sm:$0xff] }
 0x231   :  { %1342 = vmatprep.subr.mxu1 %v589_v21  ;;  %1413 = vmatprep.subr.mxu0 %v845_v22  ;;  %v996_v21 = vld [vmem:[#allocation9 + $0xfa0] sm:$0xff]  ;;  %v733_v22 = vld [vmem:[#allocation9 + $0x768] sm:$0xff] }
 0x232   :  { %1343 = vmatpush1.msra.mxu1 %v588_v23  ;;  %1414 = vmatpush1.msra.mxu0 %v844_v24  ;;  %v989_v23 = vld [vmem:[#allocation9 + $0xf68] sm:$0xff]  ;;  %v732_v24 = vld [vmem:[#allocation9 + $0x760] sm:$0xff] }
 0x233   :  { %1344 = vmatprep.subr.mxu1 %v581_v25  ;;  %1415 = vmatprep.subr.mxu0 %v837_v26  ;;  %v988_v25 = vld [vmem:[#allocation9 + $0xf60] sm:$0xff]  ;;  %v725_v26 = vld [vmem:[#allocation9 + $0x728] sm:$0xff] }
 0x234   :  { %1345 = vmatpush1.msra.mxu1 %v580_v27  ;;  %1416 = vmatpush1.msra.mxu0 %v836_v28  ;;  %v981_v27 = vld [vmem:[#allocation9 + $0xf28] sm:$0xff]  ;;  %v724_v28 = vld [vmem:[#allocation9 + $0x720] sm:$0xff] }
 0x235   :  { %1346 = vmatprep.subr.mxu1 %v573_v29  ;;  %1417 = vmatprep.subr.mxu0 %v829_v30  ;;  %v980_v29 = vld [vmem:[#allocation9 + $0xf20] sm:$0xff]  ;;  %v717_v30 = vld [vmem:[#allocation9 + $0x6e8] sm:$0xff] }
 0x236   :  { %1347 = vmatpush1.msra.mxu1 %v572_v32  ;;  %1418 = vmatpush1.msra.mxu0 %v828_v34  ;;  %v973_v32 = vld [vmem:[#allocation9 + $0xee8] sm:$0xff]  ;;  %v716_v34 = vld [vmem:[#allocation9 + $0x6e0] sm:$0xff] }
 0x237   :  { %1348 = vmatprep.subr.mxu1 %v565_v35  ;;  %1419 = vmatprep.subr.mxu0 %v821_v36  ;;  %v972_v35 = vld [vmem:[#allocation9 + $0xee0] sm:$0xff]  ;;  %v709_v36 = vld [vmem:[#allocation9 + $0x6a8] sm:$0xff] }
 0x238   :  { %1349 = vmatpush1.msra.mxu1 %v564_v37  ;;  %1420 = vmatpush1.msra.mxu0 %v820_v38  ;;  %v965_v37 = vld [vmem:[#allocation9 + $0xea8] sm:$0xff]  ;;  %v708_v38 = vld [vmem:[#allocation9 + $0x6a0] sm:$0xff] }
 0x239   :  { %1350 = vmatprep.subr.mxu1 %v557_v39  ;;  %1421 = vmatprep.subr.mxu0 %v813_v40  ;;  %v964_v39 = vld [vmem:[#allocation9 + $0xea0] sm:$0xff]  ;;  %v701_v40 = vld [vmem:[#allocation9 + $0x668] sm:$0xff] }
 0x23a   :  { %1351 = vmatpush1.msra.mxu1 %v556_v41  ;;  %1422 = vmatpush1.msra.mxu0 %v812_v42  ;;  %v957_v41 = vld [vmem:[#allocation9 + $0xe68] sm:$0xff]  ;;  %v700_v42 = vld [vmem:[#allocation9 + $0x660] sm:$0xff] }
 0x23b   :  { %1352 = vmatprep.subr.mxu1 %v549_v43  ;;  %1423 = vmatprep.subr.mxu0 %v805_v44  ;;  %v956_v43 = vld [vmem:[#allocation9 + $0xe60] sm:$0xff]  ;;  %v693_v44 = vld [vmem:[#allocation9 + $0x628] sm:$0xff] }
 0x23c   :  { %1353 = vmatpush1.msra.mxu1 %v548_v45  ;;  %1424 = vmatpush1.msra.mxu0 %v804_v50  ;;  %v949_v45 = vld [vmem:[#allocation9 + $0xe28] sm:$0xff]  ;;  %v692_v50 = vld [vmem:[#allocation9 + $0x620] sm:$0xff] }
 0x23d   :  { %1354 = vmatprep.subr.mxu1 %v541_v51  ;;  %1425 = vmatprep.subr.mxu0 %v797_v52  ;;  %v948_v51 = vld [vmem:[#allocation9 + $0xe20] sm:$0xff]  ;;  %v685_v52 = vld [vmem:[#allocation9 + $0x5e8] sm:$0xff] }
 0x23e   :  { %1355 = vmatpush1.msra.mxu1 %v540_v53  ;;  %1426 = vmatpush1.msra.mxu0 %v796_v54  ;;  %v941_v53 = vld [vmem:[#allocation9 + $0xde8] sm:$0xff]  ;;  %v684_v54 = vld [vmem:[#allocation9 + $0x5e0] sm:$0xff] }
 0x23f   :  { %1356 = vmatprep.subr.mxu1 %v533_v55  ;;  %1427 = vmatprep.subr.mxu0 %v789_v56  ;;  %v940_v55 = vld [vmem:[#allocation9 + $0xde0] sm:$0xff]  ;;  %v677_v56 = vld [vmem:[#allocation9 + $0x5a8] sm:$0xff] }
 0x240   :  { %1357 = vmatpush1.msra.mxu1 %v532_v57  ;;  %1428 = vmatpush1.msra.mxu0 %v788_v58  ;;  %v933_v57 = vld [vmem:[#allocation9 + $0xda8] sm:$0xff]  ;;  %v676_v58 = vld [vmem:[#allocation9 + $0x5a0] sm:$0xff] }
 0x241   :  { %1358 = vmatprep.subr.mxu1 %v525_v59  ;;  %1429 = vmatprep.subr.mxu0 %v781_v60  ;;  %v932_v59 = vld [vmem:[#allocation9 + $0xda0] sm:$0xff]  ;;  %v669_v60 = vld [vmem:[#allocation9 + $0x568] sm:$0xff] }
 0x242   :  { %1359 = vmatpush1.msra.mxu1 %v524_v61  ;;  %1430 = vmatpush1.msra.mxu0 %v780_v62  ;;  %v925_v61 = vld [vmem:[#allocation9 + $0xd68] sm:$0xff]  ;;  %v668_v62 = vld [vmem:[#allocation9 + $0x560] sm:$0xff] }
 0x243   :  { %1360 = vmatprep.subr.mxu1 %v517_v63  ;;  %1431 = vmatprep.subr.mxu0 %v773_v0  ;;  %v924_v63 = vld [vmem:[#allocation9 + $0xd60] sm:$0xff]  ;;  %v661_v0 = vld [vmem:[#allocation9 + $0x528] sm:$0xff] }
 0x244   :  { %1361 = vmatpush1.msra.mxu1 %v516_v1  ;;  %1432 = vmatpush1.msra.mxu0 %v772_v2  ;;  %v917_v1 = vld [vmem:[#allocation9 + $0xd28] sm:$0xff]  ;;  %v660_v2 = vld [vmem:[#allocation9 + $0x520] sm:$0xff] }
 0x245   :  { %1362 = vmatprep.subr.mxu1 %v509_v3  ;;  %1433 = vmatprep.subr.mxu0 %v765_v4  ;;  %v916_v3 = vld [vmem:[#allocation9 + $0xd20] sm:$0xff]  ;;  %v653_v4 = vld [vmem:[#allocation9 + $0x4e8] sm:$0xff] }
 0x246   :  { %1363 = vmatpush1.msra.mxu1 %v508_v5  ;;  %1434 = vmatpush1.msra.mxu0 %v764_v6  ;;  %v909_v5 = vld [vmem:[#allocation9 + $0xce8] sm:$0xff]  ;;  %v652_v6 = vld [vmem:[#allocation9 + $0x4e0] sm:$0xff] }
 0x247   :  { %1364 = vmatprep.subr.mxu1 %v501_v7  ;;  %1435 = vmatprep.subr.mxu0 %v757_v8  ;;  %v908_v7 = vld [vmem:[#allocation9 + $0xce0] sm:$0xff]  ;;  %v645_v8 = vld [vmem:[#allocation9 + $0x4a8] sm:$0xff] }
 0x248   :  { %1365 = vmatpush1.msra.mxu1 %v500_v9  ;;  %1436 = vmatpush1.msra.mxu0 %v756_v10  ;;  %v901_v9 = vld [vmem:[#allocation9 + $0xca8] sm:$0xff]  ;;  %v644_v10 = vld [vmem:[#allocation9 + $0x4a0] sm:$0xff] }
 0x249   :  { %1366 = vmatprep.subr.mxu1 %v749_v11  ;;  %1437 = vmatprep.subr.mxu0 %v1005_v12  ;;  %v900_v11 = vld [vmem:[#allocation9 + $0xca0] sm:$0xff]  ;;  %v637_v12 = vld [vmem:[#allocation9 + $0x468] sm:$0xff] }
 0x24a   :  { %1367 = vmatpush2.msra.mxu1 %v748_v15  ;;  %1438 = vmatpush2.msra.mxu0 %v1004_v17  ;;  %v893_v15 = vld [vmem:[#allocation9 + $0xc68] sm:$0xff]  ;;  %v636_v17 = vld [vmem:[#allocation9 + $0x460] sm:$0xff] }
 0x24b   :  { %1368 = vmatprep.subr.mxu1 %v741_v18  ;;  %1439 = vmatprep.subr.mxu0 %v997_v19  ;;  %v892_v18 = vld [vmem:[#allocation9 + $0xc60] sm:$0xff]  ;;  %v629_v19 = vld [vmem:[#allocation9 + $0x428] sm:$0xff] }
 0x24c   :  { %1369 = vmatpush2.msra.mxu1 %v740_v20  ;;  %1440 = vmatpush2.msra.mxu0 %v996_v21  ;;  %v885_v20 = vld [vmem:[#allocation9 + $0xc28] sm:$0xff]  ;;  %v628_v21 = vld [vmem:[#allocation9 + $0x420] sm:$0xff] }
 0x24d   :  { %1370 = vmatprep.subr.mxu1 %v733_v22  ;;  %1441 = vmatprep.subr.mxu0 %v989_v23  ;;  %v884_v22 = vld [vmem:[#allocation9 + $0xc20] sm:$0xff]  ;;  %v623_v23 = vld [vmem:[#allocation9 + $0x3f8] sm:$0xff] }
 0x24e   :  { %1371 = vmatpush2.msra.mxu1 %v732_v24  ;;  %1442 = vmatpush2.msra.mxu0 %v988_v25  ;;  %v879_v24 = vld [vmem:[#allocation9 + $0xbf8] sm:$0xff]  ;;  %v622_v25 = vld [vmem:[#allocation9 + $0x3f0] sm:$0xff] }
 0x24f   :  { %1372 = vmatprep.subr.mxu1 %v725_v26  ;;  %1443 = vmatprep.subr.mxu0 %v981_v27  ;;  %v878_v26 = vld [vmem:[#allocation9 + $0xbf0] sm:$0xff]  ;;  %v615_v27 = vld [vmem:[#allocation9 + $0x3b8] sm:$0xff] }
 0x250   :  { %1373 = vmatpush2.msra.mxu1 %v724_v28  ;;  %1444 = vmatpush2.msra.mxu0 %v980_v29  ;;  %v871_v28 = vld [vmem:[#allocation9 + $0xbb8] sm:$0xff]  ;;  %v614_v29 = vld [vmem:[#allocation9 + $0x3b0] sm:$0xff] }
 0x251   :  { %1374 = vmatprep.subr.mxu1 %v717_v30  ;;  %1445 = vmatprep.subr.mxu0 %v973_v32  ;;  %v870_v30 = vld [vmem:[#allocation9 + $0xbb0] sm:$0xff]  ;;  %v607_v32 = vld [vmem:[#allocation9 + $0x378] sm:$0xff] }
 0x252   :  { %1375 = vmatpush2.msra.mxu1 %v716_v34  ;;  %1446 = vmatpush2.msra.mxu0 %v972_v35  ;;  %v863_v34 = vld [vmem:[#allocation9 + $0xb78] sm:$0xff]  ;;  %v606_v35 = vld [vmem:[#allocation9 + $0x370] sm:$0xff] }
 0x253   :  { %1376 = vmatprep.subr.mxu1 %v709_v36  ;;  %1447 = vmatprep.subr.mxu0 %v965_v37  ;;  %v862_v36 = vld [vmem:[#allocation9 + $0xb70] sm:$0xff]  ;;  %v599_v37 = vld [vmem:[#allocation9 + $0x338] sm:$0xff] }
 0x254   :  { %1377 = vmatpush2.msra.mxu1 %v708_v38  ;;  %1448 = vmatpush2.msra.mxu0 %v964_v39  ;;  %v855_v38 = vld [vmem:[#allocation9 + $0xb38] sm:$0xff]  ;;  %v598_v39 = vld [vmem:[#allocation9 + $0x330] sm:$0xff] }
 0x255   :  { %1378 = vmatprep.subr.mxu1 %v701_v40  ;;  %1449 = vmatprep.subr.mxu0 %v957_v41  ;;  %v854_v40 = vld [vmem:[#allocation9 + $0xb30] sm:$0xff]  ;;  %v847_v41 = vld [vmem:[#allocation9 + $0xaf8] sm:$0xff] }
 0x256   :  { %1379 = vmatpush2.msra.mxu1 %v700_v42  ;;  %1450 = vmatpush2.msra.mxu0 %v956_v43  ;;  %v846_v42 = vld [vmem:[#allocation9 + $0xaf0] sm:$0xff]  ;;  %v583_v43 = vld [vmem:[#allocation9 + $0x2b8] sm:$0xff] }
 0x257   :  { %1380 = vmatprep.subr.mxu1 %v693_v44  ;;  %1451 = vmatprep.subr.mxu0 %v949_v45  ;;  %v839_v44 = vld [vmem:[#allocation9 + $0xab8] sm:$0xff]  ;;  %v582_v45 = vld [vmem:[#allocation9 + $0x2b0] sm:$0xff] }
 0x258   :  { %1381 = vmatpush2.msra.mxu1 %v692_v50  ;;  %1452 = vmatpush2.msra.mxu0 %v948_v51  ;;  %v838_v50 = vld [vmem:[#allocation9 + $0xab0] sm:$0xff]  ;;  %v575_v51 = vld [vmem:[#allocation9 + $0x278] sm:$0xff] }
 0x259   :  { %1382 = vmatprep.subr.mxu1 %v685_v52  ;;  %1453 = vmatprep.subr.mxu0 %v941_v53  ;;  %v831_v52 = vld [vmem:[#allocation9 + $0xa78] sm:$0xff]  ;;  %v574_v53 = vld [vmem:[#allocation9 + $0x270] sm:$0xff] }
 0x25a   :  { %1383 = vmatpush2.msra.mxu1 %v684_v54  ;;  %1454 = vmatpush2.msra.mxu0 %v940_v55  ;;  %v830_v54 = vld [vmem:[#allocation9 + $0xa70] sm:$0xff]  ;;  %v567_v55 = vld [vmem:[#allocation9 + $0x238] sm:$0xff] }
 0x25b   :  { %1384 = vmatprep.subr.mxu1 %v677_v56  ;;  %1455 = vmatprep.subr.mxu0 %v933_v57  ;;  %v823_v56 = vld [vmem:[#allocation9 + $0xa38] sm:$0xff]  ;;  %v566_v57 = vld [vmem:[#allocation9 + $0x230] sm:$0xff] }
 0x25c   :  { %1385 = vmatpush2.msra.mxu1 %v676_v58  ;;  %1456 = vmatpush2.msra.mxu0 %v932_v59  ;;  %v822_v58 = vld [vmem:[#allocation9 + $0xa30] sm:$0xff]  ;;  %v559_v59 = vld [vmem:[#allocation9 + $0x1f8] sm:$0xff] }
 0x25d   :  { %1386 = vmatprep.subr.mxu1 %v669_v60  ;;  %1457 = vmatprep.subr.mxu0 %v925_v61  ;;  %v815_v60 = vld [vmem:[#allocation9 + $0x9f8] sm:$0xff]  ;;  %v558_v61 = vld [vmem:[#allocation9 + $0x1f0] sm:$0xff] }
 0x25e   :  { %1387 = vmatpush2.msra.mxu1 %v668_v62  ;;  %1458 = vmatpush2.msra.mxu0 %v924_v63  ;;  %v814_v62 = vld [vmem:[#allocation9 + $0x9f0] sm:$0xff]  ;;  %v551_v63 = vld [vmem:[#allocation9 + $0x1b8] sm:$0xff] }
 0x25f   :  { %1388 = vmatprep.subr.mxu1 %v661_v0  ;;  %1459 = vmatprep.subr.mxu0 %v917_v1  ;;  %v807_v0 = vld [vmem:[#allocation9 + $0x9b8] sm:$0xff]  ;;  %v550_v1 = vld [vmem:[#allocation9 + $0x1b0] sm:$0xff] }
 0x260   :  { %1389 = vmatpush2.msra.mxu1 %v660_v2  ;;  %1460 = vmatpush2.msra.mxu0 %v916_v3  ;;  %v806_v2 = vld [vmem:[#allocation9 + $0x9b0] sm:$0xff]  ;;  %v543_v3 = vld [vmem:[#allocation9 + $0x178] sm:$0xff] }
 0x261   :  { %1390 = vmatprep.subr.mxu1 %v653_v4  ;;  %1461 = vmatprep.subr.mxu0 %v909_v5  ;;  %v799_v4 = vld [vmem:[#allocation9 + $0x978] sm:$0xff]  ;;  %v542_v5 = vld [vmem:[#allocation9 + $0x170] sm:$0xff] }
 0x262   :  { %1391 = vmatpush2.msra.mxu1 %v652_v6  ;;  %1462 = vmatpush2.msra.mxu0 %v908_v7  ;;  %v798_v6 = vld [vmem:[#allocation9 + $0x970] sm:$0xff]  ;;  %v535_v7 = vld [vmem:[#allocation9 + $0x138] sm:$0xff] }
 0x263   :  { %1392 = vmatprep.subr.mxu1 %v645_v8  ;;  %1463 = vmatprep.subr.mxu0 %v901_v9  ;;  %v791_v8 = vld [vmem:[#allocation9 + $0x938] sm:$0xff]  ;;  %v534_v9 = vld [vmem:[#allocation9 + $0x130] sm:$0xff] }
 0x264   :  { %1393 = vmatpush2.msra.mxu1 %v644_v10  ;;  %1464 = vmatpush2.msra.mxu0 %v900_v11  ;;  %v790_v10 = vld [vmem:[#allocation9 + $0x930] sm:$0xff]  ;;  %v527_v11 = vld [vmem:[#allocation9 + $0xf8] sm:$0xff] }
 0x265   :  { %1394 = vmatprep.subr.mxu1 %v637_v12  ;;  %1465 = vmatprep.subr.mxu0 %v893_v15  ;;  %v783_v12 = vld [vmem:[#allocation9 + $0x8f8] sm:$0xff]  ;;  %v526_v15 = vld [vmem:[#allocation9 + $0xf0] sm:$0xff] }
 0x266   :  { %1395 = vmatpush2.msra.mxu1 %v636_v17  ;;  %1466 = vmatpush2.msra.mxu0 %v892_v18  ;;  %v782_v17 = vld [vmem:[#allocation9 + $0x8f0] sm:$0xff]  ;;  %v519_v18 = vld [vmem:[#allocation9 + $0xb8] sm:$0xff] }
 0x267   :  { %1396 = vmatprep.subr.mxu1 %v629_v19  ;;  %1467 = vmatprep.subr.mxu0 %v885_v20  ;;  %v775_v19 = vld [vmem:[#allocation9 + $0x8b8] sm:$0xff]  ;;  %v518_v20 = vld [vmem:[#allocation9 + $0xb0] sm:$0xff] }
 0x268   :  { %1397 = vmatpush2.msra.mxu1 %v628_v21  ;;  %1468 = vmatpush2.msra.mxu0 %v884_v22  ;;  %v774_v21 = vld [vmem:[#allocation9 + $0x8b0] sm:$0xff]  ;;  %v511_v22 = vld [vmem:[#allocation9 + $0x78] sm:$0xff] }
 0x269   :  { %1399 = vmatmul.mubr.f32.vlgmr.msra.gmra.mxu1 %v1896_v48  ;;  %1470 = vmatmul.mubr.f32.vlgmr.msra.gmra.mxu0 %v1898_v49 }
 0x26a   :  { %1476 = vmatprep.subr.mxu1 %v623_v23  ;;  %1547 = vmatprep.subr.mxu0 %v879_v24  ;;  %v767_v23 = vld [vmem:[#allocation9 + $0x878] sm:$0xff]  ;;  %v510_v24 = vld [vmem:[#allocation9 + $0x70] sm:$0xff] }
 0x26b   :  { %1477 = vmatpush1.msra.mxu1 %v622_v25  ;;  %1540 = vmatprep.mubr.f32.mxu1 %v1892_v46  ;;  %v591_v46 = vld [vmem:[#allocation9 + $0x2f8] sm:$0xff]  ;;  %v766_v25 = vld [vmem:[#allocation9 + $0x870] sm:$0xff] }
 0x26c   :  { %1548 = vmatpush1.msra.mxu0 %v878_v26  ;;  %1611 = vmatprep.mubr.f32.mxu0 %v1894_v47  ;;  %v590_v47 = vld [vmem:[#allocation9 + $0x2f0] sm:$0xff]  ;;  %v503_v26 = vld [vmem:[#allocation9 + $0x38] sm:$0xff] }
 0x26d   :  { %1478 = vmatprep.subr.mxu1 %v615_v27  ;;  %1549 = vmatprep.subr.mxu0 %v871_v28  ;;  %v759_v27 = vld [vmem:[#allocation9 + $0x838] sm:$0xff]  ;;  %v502_v28 = vld [vmem:[#allocation9 + $0x30] sm:$0xff] }
 0x26e   :  { %1479 = vmatpush1.msra.mxu1 %v614_v29  ;;  %1550 = vmatpush1.msra.mxu0 %v870_v30  ;;  %v758_v29 = vld [vmem:[#allocation9 + $0x830] sm:$0xff]  ;;  %v751_v30 = vld [vmem:[#allocation9 + $0x7f8] sm:$0xff] }
 0x26f   :  { %1480 = vmatprep.subr.mxu1 %v607_v32  ;;  %1551 = vmatprep.subr.mxu0 %v863_v34  ;;  %v1007_v32 = vld [vmem:[#allocation9 + $0xff8] sm:$0xff]  ;;  %v750_v34 = vld [vmem:[#allocation9 + $0x7f0] sm:$0xff] }
 0x270   :  { %1481 = vmatpush1.msra.mxu1 %v606_v35  ;;  %1552 = vmatpush1.msra.mxu0 %v862_v36  ;;  %v1006_v35 = vld [vmem:[#allocation9 + $0xff0] sm:$0xff]  ;;  %v743_v36 = vld [vmem:[#allocation9 + $0x7b8] sm:$0xff] }
 0x271   :  { %1482 = vmatprep.subr.mxu1 %v599_v37  ;;  %1553 = vmatprep.subr.mxu0 %v855_v38  ;;  %v999_v37 = vld [vmem:[#allocation9 + $0xfb8] sm:$0xff]  ;;  %v742_v38 = vld [vmem:[#allocation9 + $0x7b0] sm:$0xff] }
 0x272   :  { %1483 = vmatpush1.msra.mxu1 %v598_v39  ;;  %1554 = vmatpush1.msra.mxu0 %v854_v40  ;;  %v998_v39 = vld [vmem:[#allocation9 + $0xfb0] sm:$0xff]  ;;  %v735_v40 = vld [vmem:[#allocation9 + $0x778] sm:$0xff] }
 0x273   :  { %1484 = vmatprep.subr.mxu1 %v591_v46  ;;  %1555 = vmatprep.subr.mxu0 %v847_v41  ;;  %v991_v46 = vld [vmem:[#allocation9 + $0xf78] sm:$0xff]  ;;  %v734_v41 = vld [vmem:[#allocation9 + $0x770] sm:$0xff] }
 0x274   :  { %1485 = vmatpush1.msra.mxu1 %v590_v47  ;;  %1556 = vmatpush1.msra.mxu0 %v846_v42  ;;  %v990_v47 = vld [vmem:[#allocation9 + $0xf70] sm:$0xff]  ;;  %v727_v42 = vld [vmem:[#allocation9 + $0x738] sm:$0xff] }
 0x275   :  { %1486 = vmatprep.subr.mxu1 %v583_v43  ;;  %1557 = vmatprep.subr.mxu0 %v839_v44  ;;  %v983_v43 = vld [vmem:[#allocation9 + $0xf38] sm:$0xff]  ;;  %v726_v44 = vld [vmem:[#allocation9 + $0x730] sm:$0xff] }
 0x276   :  { %1487 = vmatpush1.msra.mxu1 %v582_v45  ;;  %1558 = vmatpush1.msra.mxu0 %v838_v50  ;;  %v982_v45 = vld [vmem:[#allocation9 + $0xf30] sm:$0xff]  ;;  %v719_v50 = vld [vmem:[#allocation9 + $0x6f8] sm:$0xff] }
 0x277   :  { %1488 = vmatprep.subr.mxu1 %v575_v51  ;;  %1559 = vmatprep.subr.mxu0 %v831_v52  ;;  %v975_v51 = vld [vmem:[#allocation9 + $0xef8] sm:$0xff]  ;;  %v718_v52 = vld [vmem:[#allocation9 + $0x6f0] sm:$0xff] }
 0x278   :  { %1489 = vmatpush1.msra.mxu1 %v574_v53  ;;  %1560 = vmatpush1.msra.mxu0 %v830_v54  ;;  %v974_v53 = vld [vmem:[#allocation9 + $0xef0] sm:$0xff]  ;;  %v711_v54 = vld [vmem:[#allocation9 + $0x6b8] sm:$0xff] }
 0x279   :  { %1490 = vmatprep.subr.mxu1 %v567_v55  ;;  %1561 = vmatprep.subr.mxu0 %v823_v56  ;;  %v967_v55 = vld [vmem:[#allocation9 + $0xeb8] sm:$0xff]  ;;  %v710_v56 = vld [vmem:[#allocation9 + $0x6b0] sm:$0xff] }
 0x27a   :  { %1491 = vmatpush1.msra.mxu1 %v566_v57  ;;  %1562 = vmatpush1.msra.mxu0 %v822_v58  ;;  %v966_v57 = vld [vmem:[#allocation9 + $0xeb0] sm:$0xff]  ;;  %v703_v58 = vld [vmem:[#allocation9 + $0x678] sm:$0xff] }
 0x27b   :  { %1492 = vmatprep.subr.mxu1 %v559_v59  ;;  %1563 = vmatprep.subr.mxu0 %v815_v60  ;;  %v959_v59 = vld [vmem:[#allocation9 + $0xe78] sm:$0xff]  ;;  %v702_v60 = vld [vmem:[#allocation9 + $0x670] sm:$0xff] }
 0x27c   :  { %1493 = vmatpush1.msra.mxu1 %v558_v61  ;;  %1564 = vmatpush1.msra.mxu0 %v814_v62  ;;  %v958_v61 = vld [vmem:[#allocation9 + $0xe70] sm:$0xff]  ;;  %v695_v62 = vld [vmem:[#allocation9 + $0x638] sm:$0xff] }
 0x27d   :  { %1494 = vmatprep.subr.mxu1 %v551_v63  ;;  %1565 = vmatprep.subr.mxu0 %v807_v0  ;;  %v951_v63 = vld [vmem:[#allocation9 + $0xe38] sm:$0xff]  ;;  %v694_v0 = vld [vmem:[#allocation9 + $0x630] sm:$0xff] }
 0x27e   :  { %1495 = vmatpush1.msra.mxu1 %v550_v1  ;;  %1566 = vmatpush1.msra.mxu0 %v806_v2  ;;  %v950_v1 = vld [vmem:[#allocation9 + $0xe30] sm:$0xff]  ;;  %v687_v2 = vld [vmem:[#allocation9 + $0x5f8] sm:$0xff] }
 0x27f   :  { %1496 = vmatprep.subr.mxu1 %v543_v3  ;;  %1567 = vmatprep.subr.mxu0 %v799_v4  ;;  %v943_v3 = vld [vmem:[#allocation9 + $0xdf8] sm:$0xff]  ;;  %v686_v4 = vld [vmem:[#allocation9 + $0x5f0] sm:$0xff] }
 0x280   :  { %1497 = vmatpush1.msra.mxu1 %v542_v5  ;;  %1568 = vmatpush1.msra.mxu0 %v798_v6  ;;  %v942_v5 = vld [vmem:[#allocation9 + $0xdf0] sm:$0xff]  ;;  %v679_v6 = vld [vmem:[#allocation9 + $0x5b8] sm:$0xff] }
 0x281   :  { %1498 = vmatprep.subr.mxu1 %v535_v7  ;;  %1569 = vmatprep.subr.mxu0 %v791_v8  ;;  %v935_v7 = vld [vmem:[#allocation9 + $0xdb8] sm:$0xff]  ;;  %v678_v8 = vld [vmem:[#allocation9 + $0x5b0] sm:$0xff] }
 0x282   :  { %1499 = vmatpush1.msra.mxu1 %v534_v9  ;;  %1570 = vmatpush1.msra.mxu0 %v790_v10  ;;  %v934_v9 = vld [vmem:[#allocation9 + $0xdb0] sm:$0xff]  ;;  %v671_v10 = vld [vmem:[#allocation9 + $0x578] sm:$0xff] }
 0x283   :  { %1500 = vmatprep.subr.mxu1 %v527_v11  ;;  %1571 = vmatprep.subr.mxu0 %v783_v12  ;;  %v927_v11 = vld [vmem:[#allocation9 + $0xd78] sm:$0xff]  ;;  %v670_v12 = vld [vmem:[#allocation9 + $0x570] sm:$0xff] }
 0x284   :  { %1501 = vmatpush1.msra.mxu1 %v526_v15  ;;  %1572 = vmatpush1.msra.mxu0 %v782_v17  ;;  %v926_v15 = vld [vmem:[#allocation9 + $0xd70] sm:$0xff]  ;;  %v663_v17 = vld [vmem:[#allocation9 + $0x538] sm:$0xff] }
 0x285   :  { %1502 = vmatprep.subr.mxu1 %v519_v18  ;;  %1573 = vmatprep.subr.mxu0 %v775_v19  ;;  %v919_v18 = vld [vmem:[#allocation9 + $0xd38] sm:$0xff]  ;;  %v662_v19 = vld [vmem:[#allocation9 + $0x530] sm:$0xff] }
 0x286   :  { %1503 = vmatpush1.msra.mxu1 %v518_v20  ;;  %1574 = vmatpush1.msra.mxu0 %v774_v21  ;;  %v918_v20 = vld [vmem:[#allocation9 + $0xd30] sm:$0xff]  ;;  %v655_v21 = vld [vmem:[#allocation9 + $0x4f8] sm:$0xff] }
 0x287   :  { %1504 = vmatprep.subr.mxu1 %v511_v22  ;;  %1575 = vmatprep.subr.mxu0 %v767_v23  ;;  %v911_v22 = vld [vmem:[#allocation9 + $0xcf8] sm:$0xff]  ;;  %v1914_v23 = vld [vmem:[#allocation10] sm:$0xff] }
 0x288   :  { %1505 = vmatpush1.msra.mxu1 %v510_v24  ;;  %1576 = vmatpush1.msra.mxu0 %v766_v25  ;;  %v654_v24 = vld [vmem:[#allocation9 + $0x4f0] sm:$0xff] }
 0x289   :  { %1506 = vmatprep.subr.mxu1 %v503_v26  ;;  %1577 = vmatprep.subr.mxu0 %v759_v27  ;;  %v910_v25 = vld [vmem:[#allocation9 + $0xcf0] sm:$0xff]  ;;  %v647_v26 = vld [vmem:[#allocation9 + $0x4b8] sm:$0xff] }
 0x28a   :  { %1507 = vmatpush1.msra.mxu1 %v502_v28  ;;  %1578 = vmatpush1.msra.mxu0 %v758_v29  ;;  %v903_v27 = vld [vmem:[#allocation9 + $0xcb8] sm:$0xff]  ;;  %v646_v28 = vld [vmem:[#allocation9 + $0x4b0] sm:$0xff] }
 0x28b   :  { %1508 = vmatprep.subr.mxu1 %v751_v30  ;;  %1579 = vmatprep.subr.mxu0 %v1007_v32  ;;  %v902_v29 = vld [vmem:[#allocation9 + $0xcb0] sm:$0xff]  ;;  %v1013_v30 = vrot.slane %v1914_v23, %v1877_v14  ;;  %v639_v32 = vld [vmem:[#allocation9 + $0x478] sm:$0xff] }
 0x28c   :  { %1509 = vmatpush2.msra.mxu1 %v750_v34  ;;  %1580 = vmatpush2.msra.mxu0 %v1006_v35  ;;  %v895_v34 = vld [vmem:[#allocation9 + $0xc78] sm:$0xff]  ;;  %v638_v35 = vld [vmem:[#allocation9 + $0x470] sm:$0xff] }
 0x28d   :  { %1510 = vmatprep.subr.mxu1 %v743_v36  ;;  %1581 = vmatprep.subr.mxu0 %v999_v37  ;;  %v894_v36 = vld [vmem:[#allocation9 + $0xc70] sm:$0xff]  ;;  %v1017_v37 = vrot.slane %v1914_v23, %v1880_v16 }
 0x28e   :  { %1511 = vmatpush2.msra.mxu1 %v742_v38  ;;  %1582 = vmatpush2.msra.mxu0 %v998_v39  ;;  %v631_v38 = vld [vmem:[#allocation9 + $0x438] sm:$0xff]  ;;  %v630_v14 = vld [vmem:[#allocation9 + $0x430] sm:$0xff] }
 0x28f   :  { %1512 = vmatprep.subr.mxu1 %v735_v40  ;;  %1583 = vmatprep.subr.mxu0 %v991_v46  ;;  %v887_v39 = vld [vmem:[#allocation9 + $0xc38] sm:$0xff] }
 0x290   :  { %1513 = vmatpush2.msra.mxu1 %v734_v41  ;;  %1584 = vmatpush2.msra.mxu0 %v990_v47  ;;  %v886_v41 = vld [vmem:[#allocation9 + $0xc30] sm:$0xff] }
 0x291   :  { %1514 = vmatprep.subr.mxu1 %v727_v42  ;;  %1585 = vmatprep.subr.mxu0 %v983_v43 }
 0x292   :  { %1515 = vmatpush2.msra.mxu1 %v726_v44  ;;  %1586 = vmatpush2.msra.mxu0 %v982_v45 }
 0x293   :  { %1516 = vmatprep.subr.mxu1 %v719_v50  ;;  %1587 = vmatprep.subr.mxu0 %v975_v51 }
 0x294   :  { %1517 = vmatpush2.msra.mxu1 %v718_v52  ;;  %1588 = vmatpush2.msra.mxu0 %v974_v53  ;;  %v1021_v52 = vrot.slane %v1914_v23, %v340_v31 }
 0x295   :  { %1518 = vmatprep.subr.mxu1 %v711_v54  ;;  %1589 = vmatprep.subr.mxu0 %v967_v55 }
 0x296   :  { %1519 = vmatpush2.msra.mxu1 %v710_v56  ;;  %1590 = vmatpush2.msra.mxu0 %v966_v57 }
 0x297   :  { %1520 = vmatprep.subr.mxu1 %v703_v58  ;;  %1591 = vmatprep.subr.mxu0 %v959_v59 }
 0x298   :  { %1521 = vmatpush2.msra.mxu1 %v702_v60  ;;  %1592 = vmatpush2.msra.mxu0 %v958_v61  ;;  %v1032_v61 = vsub.s32 5, %v1874_v13 }
 0x299   :  { %1522 = vmatprep.subr.mxu1 %v695_v62  ;;  %1593 = vmatprep.subr.mxu0 %v951_v63 }
 0x29a   :  { %1523 = vmatpush2.msra.mxu1 %v694_v0  ;;  %1594 = vmatpush2.msra.mxu0 %v950_v1  ;;  %v1033_v63 = vrot.slane %v1914_v23, %v1032_v61 }
 0x29b   :  { %1524 = vmatprep.subr.mxu1 %v687_v2  ;;  %1595 = vmatprep.subr.mxu0 %v943_v3 }
 0x29c   :  { %1525 = vmatpush2.msra.mxu1 %v686_v4  ;;  %1596 = vmatpush2.msra.mxu0 %v942_v5 }
 0x29d   :  { %1526 = vmatprep.subr.mxu1 %v679_v6  ;;  %1597 = vmatprep.subr.mxu0 %v935_v7 }
 0x29e   :  { %1527 = vmatpush2.msra.mxu1 %v678_v8  ;;  %1598 = vmatpush2.msra.mxu0 %v934_v9 }
 0x29f   :  { %1528 = vmatprep.subr.mxu1 %v671_v10  ;;  %1599 = vmatprep.subr.mxu0 %v927_v11  ;;  %v1036_v10 = vsub.s32 6, %v1874_v13  ;;  %v1040_v11 = vsub.s32 7, %v1874_v13 }
 0x2a0   :  { %1529 = vmatpush2.msra.mxu1 %v670_v12  ;;  %1600 = vmatpush2.msra.mxu0 %v926_v15 }
 0x2a1   :  { %1530 = vmatprep.subr.mxu1 %v663_v17  ;;  %1601 = vmatprep.subr.mxu0 %v919_v18  ;;  %v1037_v12 = vrot.slane %v1914_v23, %v1036_v10  ;;  %v1041_v15 = vrot.slane %v1914_v23, %v1040_v11 }
 0x2a2   :  { %1531 = vmatpush2.msra.mxu1 %v662_v19  ;;  %1602 = vmatpush2.msra.mxu0 %v918_v20 }
 0x2a3   :  { %1532 = vmatprep.subr.mxu1 %v655_v21  ;;  %1603 = vmatprep.subr.mxu0 %v911_v22 }
 0x2a4   :  { %1533 = vmatpush2.msra.mxu1 %v654_v24  ;;  %1604 = vmatpush2.msra.mxu0 %v910_v25 }
 0x2a5   :  { %1534 = vmatprep.subr.mxu1 %v647_v26  ;;  %1605 = vmatprep.subr.mxu0 %v903_v27 }
 0x2a6   :  { %1535 = vmatpush2.msra.mxu1 %v646_v28  ;;  %1606 = vmatpush2.msra.mxu0 %v902_v29  ;;  %v1116_v40 = vpop.f32.mrf.mxu1  ;;  %v1187_v46 = vpop.f32.mrf.mxu0 }
 0x2a7   :  { %1536 = vmatprep.subr.mxu1 %v639_v32  ;;  %1607 = vmatprep.subr.mxu0 %v895_v34  ;;  %v1117_v47 = vadd.f32 %v1116_v40, %v1013_v30 }
 0x2a8   :  { %1537 = vmatpush2.msra.mxu1 %v638_v35  ;;  %1608 = vmatpush2.msra.mxu0 %v894_v36  ;;  %v1118_v42 = vpop.f32.mrf.mxu1  ;;  %v1189_v16 = vpop.f32.mrf.mxu0 }
 0x2a9   :  { %1538 = vmatprep.subr.mxu1 %v631_v38  ;;  %1609 = vmatprep.subr.mxu0 %v887_v39  ;;  %v1188_v43 = vadd.f32 %v1187_v46, %v1117_v47  ;;  %v1119_v44 = vadd.f32 %v1118_v42, %v1017_v37 }
 0x2aa   :  { %1539 = vmatpush2.msra.mxu1 %v630_v14  ;;  %1610 = vmatpush2.msra.mxu0 %v886_v41 }
 0x2ab   :  { %1541 = vmatmul.mubr.f32.vlgmr.msra.gmra.mxu1 %v1896_v48  ;;  %1612 = vmatmul.mubr.f32.vlgmr.msra.gmra.mxu0 %v1898_v49  ;;  %1656 = vtanh.f32 %v1188_v43  ;;  %v1190_v45 = vadd.f32 %v1189_v16, %v1119_v44  ;;  %v1025_v48 = vrot.slane %v1914_v23, %v344_v33  ;;  %v1028_v33 = vsub.s32 4, %v1874_v13 }
 0x2ad   :  { %1658 = vtanh.f32 %v1190_v45  ;;  %v1029_v62 = vrot.slane %v1914_v23, %v1028_v33 }
 0x2b8   :  { %v1657_v50 = vpop.eup %1656 }
 0x2b9   :  { %1626 = vst [vmem:[%s1967_s7] sm:$0xff] %v1657_v50 }
 0x2ba   :  { %v1659_v51 = vpop.eup %1658 }
 0x2bb   :  { %1627 = vst [vmem:[%s1967_s7 + $0x8] sm:$0xff] %v1659_v51 }
 0x2e7   :  { %v1258_v49 = vpop.f32.mrf.mxu1  ;;  %v1329_v53 = vpop.f32.mrf.mxu0 }
 0x2e8   :  { %v1259_v54 = vadd.f32 %v1258_v49, %v1021_v52 }
 0x2e9   :  { %v1260_v55 = vpop.f32.mrf.mxu1  ;;  %v1331_v58 = vpop.f32.mrf.mxu0 }
 0x2ea   :  { %v1330_v56 = vadd.f32 %v1329_v53, %v1259_v54  ;;  %v1261_v57 = vadd.f32 %v1260_v55, %v1025_v48 }
 0x2ec   :  { %1660 = vtanh.f32 %v1330_v56  ;;  %v1332_v59 = vadd.f32 %v1331_v58, %v1261_v57 }
 0x2ee   :  { %1662 = vtanh.f32 %v1332_v59 }
 0x2f9   :  { %v1661_v60 = vpop.eup %1660 }
 0x2fa   :  { %1628 = vst [vmem:[%s1967_s7 + $0x10] sm:$0xff] %v1661_v60 }
 0x2fb   :  { %v1663_v31 = vpop.eup %1662 }
 0x2fc   :  { %1629 = vst [vmem:[%s1967_s7 + $0x18] sm:$0xff] %v1663_v31 }
 0x329   :  { %v1400_v0 = vpop.f32.mrf.mxu1  ;;  %v1471_v1 = vpop.f32.mrf.mxu0 }
 0x32a   :  { %v1401_v2 = vadd.f32 %v1400_v0, %v1029_v62 }
 0x32b   :  { %v1402_v3 = vpop.f32.mrf.mxu1  ;;  %v1473_v6 = vpop.f32.mrf.mxu0 }
 0x32c   :  { %v1472_v4 = vadd.f32 %v1471_v1, %v1401_v2  ;;  %v1403_v5 = vadd.f32 %v1402_v3, %v1033_v63 }
 0x32e   :  { %1664 = vtanh.f32 %v1472_v4  ;;  %v1474_v7 = vadd.f32 %v1473_v6, %v1403_v5 }
 0x330   :  { %1666 = vtanh.f32 %v1474_v7 }
 0x33b   :  { %v1665_v8 = vpop.eup %1664 }
 0x33c   :  { %1630 = vst [vmem:[%s1967_s7 + $0x20] sm:$0xff] %v1665_v8 }
 0x33d   :  { %v1667_v9 = vpop.eup %1666 }
 0x33e   :  { %1631 = vst [vmem:[%s1967_s7 + $0x28] sm:$0xff] %v1667_v9 }
 0x36b   :  { %v1542_v17 = vpop.f32.mrf.mxu1  ;;  %v1613_v18 = vpop.f32.mrf.mxu0 }
 0x36c   :  { %v1543_v19 = vadd.f32 %v1542_v17, %v1037_v12 }
 0x36d   :  { %v1544_v20 = vpop.f32.mrf.mxu1  ;;  %v1615_v24 = vpop.f32.mrf.mxu0 }
 0x36e   :  { %v1614_v21 = vadd.f32 %v1613_v18, %v1543_v19  ;;  %v1545_v22 = vadd.f32 %v1544_v20, %v1041_v15 }
 0x370   :  { %1668 = vtanh.f32 %v1614_v21  ;;  %v1616_v25 = vadd.f32 %v1615_v24, %v1545_v22 }
 0x372   :  { %1670 = vtanh.f32 %v1616_v25 }
 0x37d   :  { %v1669_v26 = vpop.eup %1668 }
 0x37e   :  { %1632 = vst [vmem:[%s1967_s7 + $0x30] sm:$0xff] %v1669_v26 }
 0x37f   :  { %v1671_v13 = vpop.eup %1670 }
 0x380   :  { %1633 = vst [vmem:[%s1967_s7 + $0x38] sm:$0xff] %v1671_v13 }
 0x381   :  { %1638 = vsyncpa [#allocation3], 1 }
 0x382   :  { %1639 = vsyncpa [#allocation5], 1 }
 0x383   :  { %1640 = vsyncpa [#allocation8], 1 }
 0x384   :  { %1641 = vsyncpa [#allocation11], 1 }

</bundles_post_ra>
